<compile_context>
chip_gen: v6e
topology: v6e:2x2x1
jax: 0.10.0
libtpu: 0.0.40
codegen_flags: <defaults>
</compile_context>

<pallas_src>
import functools

import jax
import jax.numpy as jnp
from jax.experimental import pallas as pl
from jax.experimental.pallas import tpu as pltpu


# ----------------------------- config ---------------------------------------

VOCAB = 64
MAX_POS = 32
HIDDEN = 32          # config.hidden_size
NUM_LAYERS = 2
NUM_HEADS = 2
HEAD_DIM = HIDDEN // NUM_HEADS
INTERMEDIATE = 64
HIDDEN_DIM = 16      # regression head hidden_dim
NUM_MODELS = 4       # FLAG_VICUNA_DATA_ONLY == False path
MASK_BIAS = -10000.0

_VMEM = pl.BlockSpec(memory_space=pltpu.MemorySpace.VMEM)


# ----------------------------- in-kernel helpers -----------------------------

def _ln(x, g, b):
    mean = jnp.mean(x, axis=-1, keepdims=True)
    xc = x - mean
    var = jnp.mean(xc * xc, axis=-1, keepdims=True)
    return xc * jax.lax.rsqrt(var + 1e-12) * g + b


def _gelu(x):
    # exact (erf-based) GELU, matching torch.nn.functional.gelu default
    return 0.5 * x * (1.0 + jax.lax.erf(x * 0.7071067811865476))


# ----------------------------- fused Pallas kernel ---------------------------

def _fused_forward_kernel(ids_ref, mask_ref, mn_ref,
                          emb_tab_ref, vecs_ref,
                          qkv_ref, wo_ref, w1_ref, w2_ref,
                          cls_w_ref, fc1_wa_ref, fc1_wb_ref, fc2_w_ref,
                          head_b_ref, o_ref, *,
                          batch, seq, num_layers, num_heads, head_dim,
                          hidden, inter):
    bs = batch * seq
    scale = float(head_dim) ** -0.5          # fold 1/sqrt(Dh) into q

    # ---- embeddings: one-hot gather on the MXU + (pos + type) add + LN ----
    ids = ids_ref[...]                                            # (BS, 1) i32
    lane = jax.lax.broadcasted_iota(jnp.int32, (bs, VOCAB), 1)
    onehot = jnp.where(lane == ids, 1.0, 0.0)                     # (BS, VOCAB)
    we = jnp.dot(onehot, emb_tab_ref[0:VOCAB, :],
                 preferred_element_type=jnp.float32)              # (BS, H)
    pos_type = emb_tab_ref[VOCAB:VOCAB + seq, :]                  # (S, H)
    x = (we.reshape(batch, seq, hidden) + pos_type[None, :, :]).reshape(bs, hidden)
    x = _ln(x, vecs_ref[0:1, :], vecs_ref[1:2, :])

    # ---- additive attention-mask bias, hoisted out of all layers/heads ----
    bias = jnp.broadcast_to((1.0 - mask_ref[...]) * MASK_BIAS,
                            (batch, seq, seq))                    # (B, S, S)

    # ---- encoder layers (statically unrolled) ----
    for l in range(num_layers):
        # fused QKV projection: single (BS,H) @ (H,3H) MXU push + bias row
        qkv = (jnp.dot(x, qkv_ref[l, 0:hidden, :],
                       preferred_element_type=jnp.float32)
               + qkv_ref[l, hidden:hidden + 1, :])                # (BS, 3H)

        attn = jnp.zeros((bs, hidden), jnp.float32)
        for h in range(num_heads):
            c0 = h * head_dim
            q = qkv[:, c0:c0 + head_dim] * scale
            k = qkv[:, hidden + c0:hidden + c0 + head_dim]
            v = qkv[:, 2 * hidden + c0:2 * hidden + c0 + head_dim]
            q3 = q.reshape(batch, seq, head_dim)
            k3 = k.reshape(batch, seq, head_dim)
            v3 = v.reshape(batch, seq, head_dim)

            s = jnp.einsum('bqd,bkd->bqk', q3, k3,
                           preferred_element_type=jnp.float32) + bias
            m = jnp.max(s, axis=-1, keepdims=True)
            p = jnp.exp(s - m)
            p = p * pl.reciprocal(jnp.sum(p, axis=-1, keepdims=True), approx=True)
            ctx = jnp.einsum('bqk,bkd->bqd', p, v3,
                             preferred_element_type=jnp.float32)  # (B, S, Dh)

            # per-head output projection via sublane-sliced rows of W_o
            attn = attn + jnp.dot(ctx.reshape(bs, head_dim),
                                  wo_ref[l, c0:c0 + head_dim, :],
                                  preferred_element_type=jnp.float32)
        attn = attn + wo_ref[l, hidden:hidden + 1, :]             # + b_o

        base = 2 + 4 * l
        x1 = _ln(attn + x, vecs_ref[base:base + 1, :], vecs_ref[base + 1:base + 2, :])

        hmid = _gelu(jnp.dot(x1, w1_ref[l, 0:hidden, :],
                             preferred_element_type=jnp.float32)
                     + w1_ref[l, hidden:hidden + 1, :])
        f = (jnp.dot(hmid, w2_ref[l, 0:inter, :],
                     preferred_element_type=jnp.float32)
             + w2_ref[l, inter:inter + 1, :])
        x = _ln(f + x1, vecs_ref[base + 2:base + 3, :], vecs_ref[base + 3:base + 4, :])

    # ---- regression head on the CLS token (fused in the same kernel) ----
    cls = x.reshape(batch, seq, hidden)[:, 0:1, :].reshape(batch, hidden)
    h0 = jnp.tanh(jnp.dot(cls, cls_w_ref[...],
                          preferred_element_type=jnp.float32)
                  + head_b_ref[0:1, :])
    # concat((h0, model_name)) @ fc1_w  ==  h0 @ fc1_w[:HD] + model_name @ fc1_w[HD:]
    h1 = jnp.tanh(jnp.dot(h0, fc1_wa_ref[...],
                          preferred_element_type=jnp.float32)
                  + jnp.dot(mn_ref[...], fc1_wb_ref[...],
                            preferred_element_type=jnp.float32)
                  + head_b_ref[1:2, :])
    out = (jnp.dot(h1, fc2_w_ref[...], preferred_element_type=jnp.float32)
           + head_b_ref[2:3, 0:1])
    o_ref[...] = out.astype(o_ref.dtype)


# ----------------------------- params ----------------------------------------

def init_params(key):
    p = {}

    def nrm(k, shape, scale=0.02):
        return (scale * jax.random.normal(k, shape)).astype(jnp.float32)

    keys = iter(jax.random.split(key, 64))
    p["word_emb"] = nrm(next(keys), (VOCAB, HIDDEN))
    p["pos_emb"] = nrm(next(keys), (MAX_POS, HIDDEN))
    p["type_emb"] = nrm(next(keys), (2, HIDDEN))
    p["emb_ln_g"] = jnp.ones((HIDDEN,), jnp.float32)
    p["emb_ln_b"] = jnp.zeros((HIDDEN,), jnp.float32)

    p["layers"] = []
    for _ in range(NUM_LAYERS):
        lp = {
            "wq": nrm(next(keys), (HIDDEN, HIDDEN)), "bq": jnp.zeros((HIDDEN,), jnp.float32),
            "wk": nrm(next(keys), (HIDDEN, HIDDEN)), "bk": jnp.zeros((HIDDEN,), jnp.float32),
            "wv": nrm(next(keys), (HIDDEN, HIDDEN)), "bv": jnp.zeros((HIDDEN,), jnp.float32),
            "wo": nrm(next(keys), (HIDDEN, HIDDEN)), "bo": jnp.zeros((HIDDEN,), jnp.float32),
            "ln1_g": jnp.ones((HIDDEN,), jnp.float32), "ln1_b": jnp.zeros((HIDDEN,), jnp.float32),
            "w1": nrm(next(keys), (HIDDEN, INTERMEDIATE)), "b1": jnp.zeros((INTERMEDIATE,), jnp.float32),
            "w2": nrm(next(keys), (INTERMEDIATE, HIDDEN)), "b2": jnp.zeros((HIDDEN,), jnp.float32),
            "ln2_g": jnp.ones((HIDDEN,), jnp.float32), "ln2_b": jnp.zeros((HIDDEN,), jnp.float32),
        }
        p["layers"].append(lp)

    p["cls_w"] = nrm(next(keys), (HIDDEN, HIDDEN_DIM))
    p["cls_b"] = jnp.zeros((HIDDEN_DIM,), jnp.float32)
    p["fc1_w"] = nrm(next(keys), (HIDDEN_DIM + NUM_MODELS, HIDDEN_DIM))
    p["fc1_b"] = jnp.zeros((HIDDEN_DIM,), jnp.float32)
    p["fc2_w"] = nrm(next(keys), (HIDDEN_DIM, 1))
    p["fc2_b"] = jnp.zeros((1,), jnp.float32)
    return p


def pack_params(p):
    """One-time host-side repack into a few stacked, kernel-ready tensors."""
    qkv, wo, w1, w2 = [], [], [], []
    vec_rows = [p["emb_ln_g"], p["emb_ln_b"]]
    for lp in p["layers"]:
        w_qkv = jnp.concatenate([lp["wq"], lp["wk"], lp["wv"]], axis=1)   # (H, 3H)
        b_qkv = jnp.concatenate([lp["bq"], lp["bk"], lp["bv"]])[None, :]  # (1, 3H)
        qkv.append(jnp.concatenate([w_qkv, b_qkv], axis=0))               # (H+1, 3H)
        wo.append(jnp.concatenate([lp["wo"], lp["bo"][None, :]], axis=0)) # (H+1, H)
        w1.append(jnp.concatenate([lp["w1"], lp["b1"][None, :]], axis=0)) # (H+1, I)
        w2.append(jnp.concatenate([lp["w2"], lp["b2"][None, :]], axis=0)) # (I+1, H)
        vec_rows += [lp["ln1_g"], lp["ln1_b"], lp["ln2_g"], lp["ln2_b"]]

    head_b2 = jnp.zeros((HIDDEN_DIM,), jnp.float32).at[0].set(p["fc2_b"][0])
    return {
        # word table rows [0:VOCAB], (pos + token_type_0) rows [VOCAB:VOCAB+MAX_POS]
        "emb_tab": jnp.concatenate(
            [p["word_emb"], p["pos_emb"] + p["type_emb"][0][None, :]], axis=0),
        "vecs": jnp.stack(vec_rows, axis=0),          # (2 + 4L, H) LN gammas/betas
        "qkv": jnp.stack(qkv, axis=0),                # (L, H+1, 3H)
        "wo": jnp.stack(wo, axis=0),                  # (L, H+1, H)
        "w1": jnp.stack(w1, axis=0),                  # (L, H+1, I)
        "w2": jnp.stack(w2, axis=0),                  # (L, I+1, H)
        "cls_w": p["cls_w"],                          # (H, HD)
        "fc1_wa": p["fc1_w"][:HIDDEN_DIM],            # (HD, HD)
        "fc1_wb": p["fc1_w"][HIDDEN_DIM:],            # (NUM_MODELS, HD)
        "fc2_w": p["fc2_w"],                          # (HD, 1)
        "head_b": jnp.stack([p["cls_b"], p["fc1_b"], head_b2], axis=0),  # (3, HD)
    }


# ----------------------------- forward ---------------------------------------

def bert_regression_forward(packed, input_ids, attention_mask, model_name):
    B, S = input_ids.shape
    ids_col = input_ids.reshape(B * S, 1).astype(jnp.int32)
    mask_b1s = attention_mask.astype(jnp.float32).reshape(B, 1, S)

    args = (ids_col, mask_b1s, model_name.astype(jnp.float32),
            packed["emb_tab"], packed["vecs"], packed["qkv"], packed["wo"],
            packed["w1"], packed["w2"], packed["cls_w"], packed["fc1_wa"],
            packed["fc1_wb"], packed["fc2_w"], packed["head_b"])

    kernel = functools.partial(
        _fused_forward_kernel, batch=B, seq=S, num_layers=NUM_LAYERS,
        num_heads=NUM_HEADS, head_dim=HEAD_DIM, hidden=HIDDEN, inter=INTERMEDIATE)

    # TODO(synk): if B*S grows to real-BERT sizes, add a batch/query-tile grid
    # with dimension_semantics=("parallel", ...) so v7x's second TensorCore
    # gets work, and re-derive tiling against its 64 MiB VMEM.
    out = pl.pallas_call(
        kernel,
        out_shape=jax.ShapeDtypeStruct((B, 1), jnp.float32),
        in_specs=[_VMEM] * len(args),
        out_specs=_VMEM,
    )(*args)
    return jnp.squeeze(out, axis=-1)                  # (B,)


# --------------------------------- driver -------------------------------------

if __name__ == "__main__":
    key = jax.random.PRNGKey(0)
    k_params, k_ids, k_model = jax.random.split(key, 3)

    B, S = 2, 8
    params = init_params(k_params)
    packed = pack_params(params)      # one-time repack, NOT in the per-forward path

    input_ids = jax.random.randint(k_ids, (B, S), 0, VOCAB, dtype=jnp.int32)
    attention_mask = jnp.array(
        [[1, 1, 1, 1, 1, 1, 1, 1],
         [1, 1, 1, 1, 1, 0, 0, 0]], dtype=jnp.int32)
    model_name = jax.nn.one_hot(
        jax.random.randint(k_model, (B,), 0, NUM_MODELS), NUM_MODELS, dtype=jnp.float32)

    fwd = jax.jit(bert_regression_forward)
    out = fwd(packed, input_ids, attention_mask, model_name)
    out = jax.block_until_ready(out)
    assert out.shape == (B,) and out.dtype == jnp.float32
    print("KERNEL_OK")
</pallas_src>

<mosaic_0001>
module attributes {stable_mosaic.version = 11 : i64} {
  func.func @_fused_forward_kernel(%arg0: memref<16x1xi32, #tpu.memory_space<vmem>>, %arg1: memref<2x1x8xf32, #tpu.memory_space<vmem>>, %arg2: memref<2x4xf32, #tpu.memory_space<vmem>>, %arg3: memref<96x32xf32, #tpu.memory_space<vmem>>, %arg4: memref<10x32xf32, #tpu.memory_space<vmem>>, %arg5: memref<2x33x96xf32, #tpu.memory_space<vmem>>, %arg6: memref<2x33x32xf32, #tpu.memory_space<vmem>>, %arg7: memref<2x33x64xf32, #tpu.memory_space<vmem>>, %arg8: memref<2x65x32xf32, #tpu.memory_space<vmem>>, %arg9: memref<32x16xf32, #tpu.memory_space<vmem>>, %arg10: memref<16x16xf32, #tpu.memory_space<vmem>>, %arg11: memref<4x16xf32, #tpu.memory_space<vmem>>, %arg12: memref<16x1xf32, #tpu.memory_space<vmem>>, %arg13: memref<3x16xf32, #tpu.memory_space<vmem>>, %arg14: memref<2x1xf32, #tpu.memory_space<vmem>>) attributes {dimension_semantics = [], scalar_prefetch = 0 : i64, scratch_operands = 0 : i64, tpu.core_type = #tpu.core_type<tc>} {
    %c0 = arith.constant 0 : index
    %c0_0 = arith.constant 0 : index
    %0 = vector.load %arg0[%c0, %c0_0] : memref<16x1xi32, #tpu.memory_space<vmem>>, vector<16x1xi32>
    %1 = tpu.iota {dimensions = array<i32: 1>} : vector<16x64xi32>
    %2 = vector.broadcast %0 : vector<16x1xi32> to vector<16x64xi32>
    %3 = arith.cmpi eq, %1, %2 : vector<16x64xi32>
    %cst = arith.constant 1.000000e+00 : f32
    %cst_1 = arith.constant 0.000000e+00 : f32
    %4 = vector.broadcast %cst : f32 to vector<16x64xf32>
    %5 = vector.broadcast %cst_1 : f32 to vector<16x64xf32>
    %6 = arith.select %3, %4, %5 : vector<16x64xi1>, vector<16x64xf32>
    %c0_2 = arith.constant 0 : index
    %c0_3 = arith.constant 0 : index
    %7 = vector.load %arg3[%c0_2, %c0_3] : memref<96x32xf32, #tpu.memory_space<vmem>>, vector<64x32xf32>
    %cst_4 = arith.constant dense<0.000000e+00> : vector<16x32xf32>
    %8 = tpu.matmul %6, %7, %cst_4 {dimension_numbers = #tpu.dot_dimension_numbers<[1], [0], [0], [1], [0, 0, 1, 1], [], []>} : vector<16x64xf32>, vector<64x32xf32>, vector<16x32xf32> -> vector<16x32xf32>
    %c64 = arith.constant 64 : index
    %c0_5 = arith.constant 0 : index
    %9 = vector.load %arg3[%c64, %c0_5] : memref<96x32xf32, #tpu.memory_space<vmem>>, vector<8x32xf32>
    %10 = vector.shape_cast %8 : vector<16x32xf32> to vector<2x8x32xf32>
    %11 = vector.shape_cast %9 : vector<8x32xf32> to vector<1x8x32xf32>
    %12 = vector.broadcast %11 : vector<1x8x32xf32> to vector<2x8x32xf32>
    %13 = arith.addf %10, %12 : vector<2x8x32xf32>
    %14 = vector.shape_cast %13 : vector<2x8x32xf32> to vector<16x32xf32>
    %c0_6 = arith.constant 0 : index
    %c0_7 = arith.constant 0 : index
    %15 = vector.load %arg4[%c0_6, %c0_7] : memref<10x32xf32, #tpu.memory_space<vmem>>, vector<1x32xf32>
    %c1 = arith.constant 1 : index
    %c0_8 = arith.constant 0 : index
    %16 = vector.load %arg4[%c1, %c0_8] : memref<10x32xf32, #tpu.memory_space<vmem>>, vector<1x32xf32>
    %cst_9 = arith.constant dense<0.000000e+00> : vector<16xf32>
    %17 = vector.multi_reduction <add>, %14, %cst_9 [1] : vector<16x32xf32> to vector<16xf32>
    %18 = vector.shape_cast %17 : vector<16xf32> to vector<16x1xf32>
    %cst_10 = arith.constant 3.200000e+01 : f32
    %19 = vector.broadcast %cst_10 : f32 to vector<16x1xf32>
    %20 = arith.divf %18, %19 : vector<16x1xf32>
    %21 = vector.broadcast %20 : vector<16x1xf32> to vector<16x32xf32>
    %22 = arith.subf %14, %21 : vector<16x32xf32>
    %23 = arith.mulf %22, %22 : vector<16x32xf32>
    %cst_11 = arith.constant dense<0.000000e+00> : vector<16xf32>
    %24 = vector.multi_reduction <add>, %23, %cst_11 [1] : vector<16x32xf32> to vector<16xf32>
    %25 = vector.shape_cast %24 : vector<16xf32> to vector<16x1xf32>
    %cst_12 = arith.constant 3.200000e+01 : f32
    %26 = vector.broadcast %cst_12 : f32 to vector<16x1xf32>
    %27 = arith.divf %25, %26 : vector<16x1xf32>
    %cst_13 = arith.constant 9.99999996E-13 : f32
    %28 = vector.broadcast %cst_13 : f32 to vector<16x1xf32>
    %29 = arith.addf %27, %28 : vector<16x1xf32>
    %30 = math.rsqrt %29 : vector<16x1xf32>
    %31 = vector.broadcast %30 : vector<16x1xf32> to vector<16x32xf32>
    %32 = arith.mulf %22, %31 : vector<16x32xf32>
    %33 = vector.broadcast %15 : vector<1x32xf32> to vector<16x32xf32>
    %34 = arith.mulf %32, %33 : vector<16x32xf32>
    %35 = vector.broadcast %16 : vector<1x32xf32> to vector<16x32xf32>
    %36 = arith.addf %34, %35 : vector<16x32xf32>
    %c0_14 = arith.constant 0 : index
    %c0_15 = arith.constant 0 : index
    %c0_16 = arith.constant 0 : index
    %37 = vector.load %arg1[%c0_14, %c0_15, %c0_16] : memref<2x1x8xf32, #tpu.memory_space<vmem>>, vector<2x1x8xf32>
    %cst_17 = arith.constant 1.000000e+00 : f32
    %38 = vector.broadcast %cst_17 : f32 to vector<2x1x8xf32>
    %39 = arith.subf %38, %37 : vector<2x1x8xf32>
    %cst_18 = arith.constant -1.000000e+04 : f32
    %40 = vector.broadcast %cst_18 : f32 to vector<2x1x8xf32>
    %41 = arith.mulf %39, %40 : vector<2x1x8xf32>
    %42 = vector.shape_cast %41 : vector<2x1x8xf32> to vector<2x1x8xf32>
    %43 = vector.broadcast %42 : vector<2x1x8xf32> to vector<2x8x8xf32>
    %c0_19 = arith.constant 0 : index
    %c0_20 = arith.constant 0 : index
    %c0_21 = arith.constant 0 : index
    %44 = vector.load %arg5[%c0_19, %c0_20, %c0_21] : memref<2x33x96xf32, #tpu.memory_space<vmem>>, vector<1x32x96xf32>
    %45 = vector.shape_cast %44 : vector<1x32x96xf32> to vector<32x96xf32>
    %cst_22 = arith.constant dense<0.000000e+00> : vector<16x96xf32>
    %46 = tpu.matmul %36, %45, %cst_22 {dimension_numbers = #tpu.dot_dimension_numbers<[1], [0], [0], [1], [0, 0, 1, 1], [], []>} : vector<16x32xf32>, vector<32x96xf32>, vector<16x96xf32> -> vector<16x96xf32>
    %c0_23 = arith.constant 0 : index
    %c32 = arith.constant 32 : index
    %c0_24 = arith.constant 0 : index
    %47 = vector.load %arg5[%c0_23, %c32, %c0_24] : memref<2x33x96xf32, #tpu.memory_space<vmem>>, vector<1x1x96xf32>
    %48 = vector.shape_cast %47 : vector<1x1x96xf32> to vector<1x96xf32>
    %49 = vector.broadcast %48 : vector<1x96xf32> to vector<16x96xf32>
    %50 = arith.addf %46, %49 : vector<16x96xf32>
    %cst_25 = arith.constant 0.000000e+00 : f32
    %51 = vector.broadcast %cst_25 : f32 to vector<16x32xf32>
    %52 = vector.extract_strided_slice %50 {offsets = [0, 0], sizes = [16, 16], strides = [1, 1]} : vector<16x96xf32> to vector<16x16xf32>
    %cst_26 = arith.constant 2.500000e-01 : f32
    %53 = vector.broadcast %cst_26 : f32 to vector<16x16xf32>
    %54 = arith.mulf %52, %53 : vector<16x16xf32>
    %55 = vector.extract_strided_slice %50 {offsets = [0, 32], sizes = [16, 16], strides = [1, 1]} : vector<16x96xf32> to vector<16x16xf32>
    %56 = vector.extract_strided_slice %50 {offsets = [0, 64], sizes = [16, 16], strides = [1, 1]} : vector<16x96xf32> to vector<16x16xf32>
    %57 = vector.shape_cast %54 : vector<16x16xf32> to vector<2x8x16xf32>
    %58 = vector.shape_cast %55 : vector<16x16xf32> to vector<2x8x16xf32>
    %59 = vector.shape_cast %56 : vector<16x16xf32> to vector<2x8x16xf32>
    "tpu.trace_start"() <{level = 10 : i32, message = "bqd,bkd->bqk"}> : () -> ()
    %cst_27 = arith.constant dense<0.000000e+00> : vector<2x8x8xf32>
    %60 = tpu.matmul %57, %58, %cst_27 {dimension_numbers = #tpu.dot_dimension_numbers<[2], [2], [1], [1], [0, 0, 0, 1, 1, 1], [0], [0]>} : vector<2x8x16xf32>, vector<2x8x16xf32>, vector<2x8x8xf32> -> vector<2x8x8xf32>
    "tpu.trace_stop"() : () -> ()
    %61 = arith.addf %60, %43 : vector<2x8x8xf32>
    %cst_28 = arith.constant dense<0xFF800000> : vector<2x8xf32>
    %62 = vector.multi_reduction <maximumf>, %61, %cst_28 [2] : vector<2x8x8xf32> to vector<2x8xf32>
    %63 = vector.shape_cast %62 : vector<2x8xf32> to vector<2x8x1xf32>
    %64 = vector.broadcast %63 : vector<2x8x1xf32> to vector<2x8x8xf32>
    %65 = arith.subf %61, %64 : vector<2x8x8xf32>
    %66 = math.exp %65 : vector<2x8x8xf32>
    %cst_29 = arith.constant dense<0.000000e+00> : vector<2x8xf32>
    %67 = vector.multi_reduction <add>, %66, %cst_29 [2] : vector<2x8x8xf32> to vector<2x8xf32>
    %68 = vector.shape_cast %67 : vector<2x8xf32> to vector<2x8x1xf32>
    %69 = tpu.reciprocal %68 {approx = true} : vector<2x8x1xf32> -> vector<2x8x1xf32>
    %70 = vector.broadcast %69 : vector<2x8x1xf32> to vector<2x8x8xf32>
    %71 = arith.mulf %66, %70 : vector<2x8x8xf32>
    "tpu.trace_start"() <{level = 10 : i32, message = "bqk,bkd->bqd"}> : () -> ()
    %cst_30 = arith.constant dense<0.000000e+00> : vector<2x8x16xf32>
    %72 = tpu.matmul %71, %59, %cst_30 {dimension_numbers = #tpu.dot_dimension_numbers<[2], [1], [1], [2], [0, 0, 0, 1, 1, 2], [0], [0]>} : vector<2x8x8xf32>, vector<2x8x16xf32>, vector<2x8x16xf32> -> vector<2x8x16xf32>
    "tpu.trace_stop"() : () -> ()
    %73 = vector.shape_cast %72 : vector<2x8x16xf32> to vector<16x16xf32>
    %c0_31 = arith.constant 0 : index
    %c0_32 = arith.constant 0 : index
    %c0_33 = arith.constant 0 : index
    %74 = vector.load %arg6[%c0_31, %c0_32, %c0_33] : memref<2x33x32xf32, #tpu.memory_space<vmem>>, vector<1x16x32xf32>
    %75 = vector.shape_cast %74 : vector<1x16x32xf32> to vector<16x32xf32>
    %cst_34 = arith.constant dense<0.000000e+00> : vector<16x32xf32>
    %76 = tpu.matmul %73, %75, %cst_34 {dimension_numbers = #tpu.dot_dimension_numbers<[1], [0], [0], [1], [0, 0, 1, 1], [], []>} : vector<16x16xf32>, vector<16x32xf32>, vector<16x32xf32> -> vector<16x32xf32>
    %77 = arith.addf %51, %76 : vector<16x32xf32>
    %78 = vector.extract_strided_slice %50 {offsets = [0, 16], sizes = [16, 16], strides = [1, 1]} : vector<16x96xf32> to vector<16x16xf32>
    %cst_35 = arith.constant 2.500000e-01 : f32
    %79 = vector.broadcast %cst_35 : f32 to vector<16x16xf32>
    %80 = arith.mulf %78, %79 : vector<16x16xf32>
    %81 = vector.extract_strided_slice %50 {offsets = [0, 48], sizes = [16, 16], strides = [1, 1]} : vector<16x96xf32> to vector<16x16xf32>
    %82 = vector.extract_strided_slice %50 {offsets = [0, 80], sizes = [16, 16], strides = [1, 1]} : vector<16x96xf32> to vector<16x16xf32>
    %83 = vector.shape_cast %80 : vector<16x16xf32> to vector<2x8x16xf32>
    %84 = vector.shape_cast %81 : vector<16x16xf32> to vector<2x8x16xf32>
    %85 = vector.shape_cast %82 : vector<16x16xf32> to vector<2x8x16xf32>
    "tpu.trace_start"() <{level = 10 : i32, message = "bqd,bkd->bqk"}> : () -> ()
    %cst_36 = arith.constant dense<0.000000e+00> : vector<2x8x8xf32>
    %86 = tpu.matmul %83, %84, %cst_36 {dimension_numbers = #tpu.dot_dimension_numbers<[2], [2], [1], [1], [0, 0, 0, 1, 1, 1], [0], [0]>} : vector<2x8x16xf32>, vector<2x8x16xf32>, vector<2x8x8xf32> -> vector<2x8x8xf32>
    "tpu.trace_stop"() : () -> ()
    %87 = arith.addf %86, %43 : vector<2x8x8xf32>
    %cst_37 = arith.constant dense<0xFF800000> : vector<2x8xf32>
    %88 = vector.multi_reduction <maximumf>, %87, %cst_37 [2] : vector<2x8x8xf32> to vector<2x8xf32>
    %89 = vector.shape_cast %88 : vector<2x8xf32> to vector<2x8x1xf32>
    %90 = vector.broadcast %89 : vector<2x8x1xf32> to vector<2x8x8xf32>
    %91 = arith.subf %87, %90 : vector<2x8x8xf32>
    %92 = math.exp %91 : vector<2x8x8xf32>
    %cst_38 = arith.constant dense<0.000000e+00> : vector<2x8xf32>
    %93 = vector.multi_reduction <add>, %92, %cst_38 [2] : vector<2x8x8xf32> to vector<2x8xf32>
    %94 = vector.shape_cast %93 : vector<2x8xf32> to vector<2x8x1xf32>
    %95 = tpu.reciprocal %94 {approx = true} : vector<2x8x1xf32> -> vector<2x8x1xf32>
    %96 = vector.broadcast %95 : vector<2x8x1xf32> to vector<2x8x8xf32>
    %97 = arith.mulf %92, %96 : vector<2x8x8xf32>
    "tpu.trace_start"() <{level = 10 : i32, message = "bqk,bkd->bqd"}> : () -> ()
    %cst_39 = arith.constant dense<0.000000e+00> : vector<2x8x16xf32>
    %98 = tpu.matmul %97, %85, %cst_39 {dimension_numbers = #tpu.dot_dimension_numbers<[2], [1], [1], [2], [0, 0, 0, 1, 1, 2], [0], [0]>} : vector<2x8x8xf32>, vector<2x8x16xf32>, vector<2x8x16xf32> -> vector<2x8x16xf32>
    "tpu.trace_stop"() : () -> ()
    %99 = vector.shape_cast %98 : vector<2x8x16xf32> to vector<16x16xf32>
    %c0_40 = arith.constant 0 : index
    %c16 = arith.constant 16 : index
    %c0_41 = arith.constant 0 : index
    %100 = vector.load %arg6[%c0_40, %c16, %c0_41] : memref<2x33x32xf32, #tpu.memory_space<vmem>>, vector<1x16x32xf32>
    %101 = vector.shape_cast %100 : vector<1x16x32xf32> to vector<16x32xf32>
    %cst_42 = arith.constant dense<0.000000e+00> : vector<16x32xf32>
    %102 = tpu.matmul %99, %101, %cst_42 {dimension_numbers = #tpu.dot_dimension_numbers<[1], [0], [0], [1], [0, 0, 1, 1], [], []>} : vector<16x16xf32>, vector<16x32xf32>, vector<16x32xf32> -> vector<16x32xf32>
    %103 = arith.addf %77, %102 : vector<16x32xf32>
    %c0_43 = arith.constant 0 : index
    %c32_44 = arith.constant 32 : index
    %c0_45 = arith.constant 0 : index
    %104 = vector.load %arg6[%c0_43, %c32_44, %c0_45] : memref<2x33x32xf32, #tpu.memory_space<vmem>>, vector<1x1x32xf32>
    %105 = vector.shape_cast %104 : vector<1x1x32xf32> to vector<1x32xf32>
    %106 = vector.broadcast %105 : vector<1x32xf32> to vector<16x32xf32>
    %107 = arith.addf %103, %106 : vector<16x32xf32>
    %108 = arith.addf %107, %36 : vector<16x32xf32>
    %c2 = arith.constant 2 : index
    %c0_46 = arith.constant 0 : index
    %109 = vector.load %arg4[%c2, %c0_46] : memref<10x32xf32, #tpu.memory_space<vmem>>, vector<1x32xf32>
    %c3 = arith.constant 3 : index
    %c0_47 = arith.constant 0 : index
    %110 = vector.load %arg4[%c3, %c0_47] : memref<10x32xf32, #tpu.memory_space<vmem>>, vector<1x32xf32>
    %cst_48 = arith.constant dense<0.000000e+00> : vector<16xf32>
    %111 = vector.multi_reduction <add>, %108, %cst_48 [1] : vector<16x32xf32> to vector<16xf32>
    %112 = vector.shape_cast %111 : vector<16xf32> to vector<16x1xf32>
    %cst_49 = arith.constant 3.200000e+01 : f32
    %113 = vector.broadcast %cst_49 : f32 to vector<16x1xf32>
    %114 = arith.divf %112, %113 : vector<16x1xf32>
    %115 = vector.broadcast %114 : vector<16x1xf32> to vector<16x32xf32>
    %116 = arith.subf %108, %115 : vector<16x32xf32>
    %117 = arith.mulf %116, %116 : vector<16x32xf32>
    %cst_50 = arith.constant dense<0.000000e+00> : vector<16xf32>
    %118 = vector.multi_reduction <add>, %117, %cst_50 [1] : vector<16x32xf32> to vector<16xf32>
    %119 = vector.shape_cast %118 : vector<16xf32> to vector<16x1xf32>
    %cst_51 = arith.constant 3.200000e+01 : f32
    %120 = vector.broadcast %cst_51 : f32 to vector<16x1xf32>
    %121 = arith.divf %119, %120 : vector<16x1xf32>
    %cst_52 = arith.constant 9.99999996E-13 : f32
    %122 = vector.broadcast %cst_52 : f32 to vector<16x1xf32>
    %123 = arith.addf %121, %122 : vector<16x1xf32>
    %124 = math.rsqrt %123 : vector<16x1xf32>
    %125 = vector.broadcast %124 : vector<16x1xf32> to vector<16x32xf32>
    %126 = arith.mulf %116, %125 : vector<16x32xf32>
    %127 = vector.broadcast %109 : vector<1x32xf32> to vector<16x32xf32>
    %128 = arith.mulf %126, %127 : vector<16x32xf32>
    %129 = vector.broadcast %110 : vector<1x32xf32> to vector<16x32xf32>
    %130 = arith.addf %128, %129 : vector<16x32xf32>
    %c0_53 = arith.constant 0 : index
    %c0_54 = arith.constant 0 : index
    %c0_55 = arith.constant 0 : index
    %131 = vector.load %arg7[%c0_53, %c0_54, %c0_55] : memref<2x33x64xf32, #tpu.memory_space<vmem>>, vector<1x32x64xf32>
    %132 = vector.shape_cast %131 : vector<1x32x64xf32> to vector<32x64xf32>
    %cst_56 = arith.constant dense<0.000000e+00> : vector<16x64xf32>
    %133 = tpu.matmul %130, %132, %cst_56 {dimension_numbers = #tpu.dot_dimension_numbers<[1], [0], [0], [1], [0, 0, 1, 1], [], []>} : vector<16x32xf32>, vector<32x64xf32>, vector<16x64xf32> -> vector<16x64xf32>
    %c0_57 = arith.constant 0 : index
    %c32_58 = arith.constant 32 : index
    %c0_59 = arith.constant 0 : index
    %134 = vector.load %arg7[%c0_57, %c32_58, %c0_59] : memref<2x33x64xf32, #tpu.memory_space<vmem>>, vector<1x1x64xf32>
    %135 = vector.shape_cast %134 : vector<1x1x64xf32> to vector<1x64xf32>
    %136 = vector.broadcast %135 : vector<1x64xf32> to vector<16x64xf32>
    %137 = arith.addf %133, %136 : vector<16x64xf32>
    %cst_60 = arith.constant 5.000000e-01 : f32
    %138 = vector.broadcast %cst_60 : f32 to vector<16x64xf32>
    %139 = arith.mulf %138, %137 : vector<16x64xf32>
    %cst_61 = arith.constant 0.707106769 : f32
    %140 = vector.broadcast %cst_61 : f32 to vector<16x64xf32>
    %141 = arith.mulf %137, %140 : vector<16x64xf32>
    %142 = math.erf %141 : vector<16x64xf32>
    %cst_62 = arith.constant 1.000000e+00 : f32
    %143 = vector.broadcast %cst_62 : f32 to vector<16x64xf32>
    %144 = arith.addf %143, %142 : vector<16x64xf32>
    %145 = arith.mulf %139, %144 : vector<16x64xf32>
    %c0_63 = arith.constant 0 : index
    %c0_64 = arith.constant 0 : index
    %c0_65 = arith.constant 0 : index
    %146 = vector.load %arg8[%c0_63, %c0_64, %c0_65] : memref<2x65x32xf32, #tpu.memory_space<vmem>>, vector<1x64x32xf32>
    %147 = vector.shape_cast %146 : vector<1x64x32xf32> to vector<64x32xf32>
    %cst_66 = arith.constant dense<0.000000e+00> : vector<16x32xf32>
    %148 = tpu.matmul %145, %147, %cst_66 {dimension_numbers = #tpu.dot_dimension_numbers<[1], [0], [0], [1], [0, 0, 1, 1], [], []>} : vector<16x64xf32>, vector<64x32xf32>, vector<16x32xf32> -> vector<16x32xf32>
    %c0_67 = arith.constant 0 : index
    %c64_68 = arith.constant 64 : index
    %c0_69 = arith.constant 0 : index
    %149 = vector.load %arg8[%c0_67, %c64_68, %c0_69] : memref<2x65x32xf32, #tpu.memory_space<vmem>>, vector<1x1x32xf32>
    %150 = vector.shape_cast %149 : vector<1x1x32xf32> to vector<1x32xf32>
    %151 = vector.broadcast %150 : vector<1x32xf32> to vector<16x32xf32>
    %152 = arith.addf %148, %151 : vector<16x32xf32>
    %153 = arith.addf %152, %130 : vector<16x32xf32>
    %c4 = arith.constant 4 : index
    %c0_70 = arith.constant 0 : index
    %154 = vector.load %arg4[%c4, %c0_70] : memref<10x32xf32, #tpu.memory_space<vmem>>, vector<1x32xf32>
    %c5 = arith.constant 5 : index
    %c0_71 = arith.constant 0 : index
    %155 = vector.load %arg4[%c5, %c0_71] : memref<10x32xf32, #tpu.memory_space<vmem>>, vector<1x32xf32>
    %cst_72 = arith.constant dense<0.000000e+00> : vector<16xf32>
    %156 = vector.multi_reduction <add>, %153, %cst_72 [1] : vector<16x32xf32> to vector<16xf32>
    %157 = vector.shape_cast %156 : vector<16xf32> to vector<16x1xf32>
    %cst_73 = arith.constant 3.200000e+01 : f32
    %158 = vector.broadcast %cst_73 : f32 to vector<16x1xf32>
    %159 = arith.divf %157, %158 : vector<16x1xf32>
    %160 = vector.broadcast %159 : vector<16x1xf32> to vector<16x32xf32>
    %161 = arith.subf %153, %160 : vector<16x32xf32>
    %162 = arith.mulf %161, %161 : vector<16x32xf32>
    %cst_74 = arith.constant dense<0.000000e+00> : vector<16xf32>
    %163 = vector.multi_reduction <add>, %162, %cst_74 [1] : vector<16x32xf32> to vector<16xf32>
    %164 = vector.shape_cast %163 : vector<16xf32> to vector<16x1xf32>
    %cst_75 = arith.constant 3.200000e+01 : f32
    %165 = vector.broadcast %cst_75 : f32 to vector<16x1xf32>
    %166 = arith.divf %164, %165 : vector<16x1xf32>
    %cst_76 = arith.constant 9.99999996E-13 : f32
    %167 = vector.broadcast %cst_76 : f32 to vector<16x1xf32>
    %168 = arith.addf %166, %167 : vector<16x1xf32>
    %169 = math.rsqrt %168 : vector<16x1xf32>
    %170 = vector.broadcast %169 : vector<16x1xf32> to vector<16x32xf32>
    %171 = arith.mulf %161, %170 : vector<16x32xf32>
    %172 = vector.broadcast %154 : vector<1x32xf32> to vector<16x32xf32>
    %173 = arith.mulf %171, %172 : vector<16x32xf32>
    %174 = vector.broadcast %155 : vector<1x32xf32> to vector<16x32xf32>
    %175 = arith.addf %173, %174 : vector<16x32xf32>
    %c1_77 = arith.constant 1 : index
    %c0_78 = arith.constant 0 : index
    %c0_79 = arith.constant 0 : index
    %176 = vector.load %arg5[%c1_77, %c0_78, %c0_79] : memref<2x33x96xf32, #tpu.memory_space<vmem>>, vector<1x32x96xf32>
    %177 = vector.shape_cast %176 : vector<1x32x96xf32> to vector<32x96xf32>
    %cst_80 = arith.constant dense<0.000000e+00> : vector<16x96xf32>
    %178 = tpu.matmul %175, %177, %cst_80 {dimension_numbers = #tpu.dot_dimension_numbers<[1], [0], [0], [1], [0, 0, 1, 1], [], []>} : vector<16x32xf32>, vector<32x96xf32>, vector<16x96xf32> -> vector<16x96xf32>
    %c1_81 = arith.constant 1 : index
    %c32_82 = arith.constant 32 : index
    %c0_83 = arith.constant 0 : index
    %179 = vector.load %arg5[%c1_81, %c32_82, %c0_83] : memref<2x33x96xf32, #tpu.memory_space<vmem>>, vector<1x1x96xf32>
    %180 = vector.shape_cast %179 : vector<1x1x96xf32> to vector<1x96xf32>
    %181 = vector.broadcast %180 : vector<1x96xf32> to vector<16x96xf32>
    %182 = arith.addf %178, %181 : vector<16x96xf32>
    %cst_84 = arith.constant 0.000000e+00 : f32
    %183 = vector.broadcast %cst_84 : f32 to vector<16x32xf32>
    %184 = vector.extract_strided_slice %182 {offsets = [0, 0], sizes = [16, 16], strides = [1, 1]} : vector<16x96xf32> to vector<16x16xf32>
    %cst_85 = arith.constant 2.500000e-01 : f32
    %185 = vector.broadcast %cst_85 : f32 to vector<16x16xf32>
    %186 = arith.mulf %184, %185 : vector<16x16xf32>
    %187 = vector.extract_strided_slice %182 {offsets = [0, 32], sizes = [16, 16], strides = [1, 1]} : vector<16x96xf32> to vector<16x16xf32>
    %188 = vector.extract_strided_slice %182 {offsets = [0, 64], sizes = [16, 16], strides = [1, 1]} : vector<16x96xf32> to vector<16x16xf32>
    %189 = vector.shape_cast %186 : vector<16x16xf32> to vector<2x8x16xf32>
    %190 = vector.shape_cast %187 : vector<16x16xf32> to vector<2x8x16xf32>
    %191 = vector.shape_cast %188 : vector<16x16xf32> to vector<2x8x16xf32>
    "tpu.trace_start"() <{level = 10 : i32, message = "bqd,bkd->bqk"}> : () -> ()
    %cst_86 = arith.constant dense<0.000000e+00> : vector<2x8x8xf32>
    %192 = tpu.matmul %189, %190, %cst_86 {dimension_numbers = #tpu.dot_dimension_numbers<[2], [2], [1], [1], [0, 0, 0, 1, 1, 1], [0], [0]>} : vector<2x8x16xf32>, vector<2x8x16xf32>, vector<2x8x8xf32> -> vector<2x8x8xf32>
    "tpu.trace_stop"() : () -> ()
    %193 = arith.addf %192, %43 : vector<2x8x8xf32>
    %cst_87 = arith.constant dense<0xFF800000> : vector<2x8xf32>
    %194 = vector.multi_reduction <maximumf>, %193, %cst_87 [2] : vector<2x8x8xf32> to vector<2x8xf32>
    %195 = vector.shape_cast %194 : vector<2x8xf32> to vector<2x8x1xf32>
    %196 = vector.broadcast %195 : vector<2x8x1xf32> to vector<2x8x8xf32>
    %197 = arith.subf %193, %196 : vector<2x8x8xf32>
    %198 = math.exp %197 : vector<2x8x8xf32>
    %cst_88 = arith.constant dense<0.000000e+00> : vector<2x8xf32>
    %199 = vector.multi_reduction <add>, %198, %cst_88 [2] : vector<2x8x8xf32> to vector<2x8xf32>
    %200 = vector.shape_cast %199 : vector<2x8xf32> to vector<2x8x1xf32>
    %201 = tpu.reciprocal %200 {approx = true} : vector<2x8x1xf32> -> vector<2x8x1xf32>
    %202 = vector.broadcast %201 : vector<2x8x1xf32> to vector<2x8x8xf32>
    %203 = arith.mulf %198, %202 : vector<2x8x8xf32>
    "tpu.trace_start"() <{level = 10 : i32, message = "bqk,bkd->bqd"}> : () -> ()
    %cst_89 = arith.constant dense<0.000000e+00> : vector<2x8x16xf32>
    %204 = tpu.matmul %203, %191, %cst_89 {dimension_numbers = #tpu.dot_dimension_numbers<[2], [1], [1], [2], [0, 0, 0, 1, 1, 2], [0], [0]>} : vector<2x8x8xf32>, vector<2x8x16xf32>, vector<2x8x16xf32> -> vector<2x8x16xf32>
    "tpu.trace_stop"() : () -> ()
    %205 = vector.shape_cast %204 : vector<2x8x16xf32> to vector<16x16xf32>
    %c1_90 = arith.constant 1 : index
    %c0_91 = arith.constant 0 : index
    %c0_92 = arith.constant 0 : index
    %206 = vector.load %arg6[%c1_90, %c0_91, %c0_92] : memref<2x33x32xf32, #tpu.memory_space<vmem>>, vector<1x16x32xf32>
    %207 = vector.shape_cast %206 : vector<1x16x32xf32> to vector<16x32xf32>
    %cst_93 = arith.constant dense<0.000000e+00> : vector<16x32xf32>
    %208 = tpu.matmul %205, %207, %cst_93 {dimension_numbers = #tpu.dot_dimension_numbers<[1], [0], [0], [1], [0, 0, 1, 1], [], []>} : vector<16x16xf32>, vector<16x32xf32>, vector<16x32xf32> -> vector<16x32xf32>
    %209 = arith.addf %183, %208 : vector<16x32xf32>
    %210 = vector.extract_strided_slice %182 {offsets = [0, 16], sizes = [16, 16], strides = [1, 1]} : vector<16x96xf32> to vector<16x16xf32>
    %cst_94 = arith.constant 2.500000e-01 : f32
    %211 = vector.broadcast %cst_94 : f32 to vector<16x16xf32>
    %212 = arith.mulf %210, %211 : vector<16x16xf32>
    %213 = vector.extract_strided_slice %182 {offsets = [0, 48], sizes = [16, 16], strides = [1, 1]} : vector<16x96xf32> to vector<16x16xf32>
    %214 = vector.extract_strided_slice %182 {offsets = [0, 80], sizes = [16, 16], strides = [1, 1]} : vector<16x96xf32> to vector<16x16xf32>
    %215 = vector.shape_cast %212 : vector<16x16xf32> to vector<2x8x16xf32>
    %216 = vector.shape_cast %213 : vector<16x16xf32> to vector<2x8x16xf32>
    %217 = vector.shape_cast %214 : vector<16x16xf32> to vector<2x8x16xf32>
    "tpu.trace_start"() <{level = 10 : i32, message = "bqd,bkd->bqk"}> : () -> ()
    %cst_95 = arith.constant dense<0.000000e+00> : vector<2x8x8xf32>
    %218 = tpu.matmul %215, %216, %cst_95 {dimension_numbers = #tpu.dot_dimension_numbers<[2], [2], [1], [1], [0, 0, 0, 1, 1, 1], [0], [0]>} : vector<2x8x16xf32>, vector<2x8x16xf32>, vector<2x8x8xf32> -> vector<2x8x8xf32>
    "tpu.trace_stop"() : () -> ()
    %219 = arith.addf %218, %43 : vector<2x8x8xf32>
    %cst_96 = arith.constant dense<0xFF800000> : vector<2x8xf32>
    %220 = vector.multi_reduction <maximumf>, %219, %cst_96 [2] : vector<2x8x8xf32> to vector<2x8xf32>
    %221 = vector.shape_cast %220 : vector<2x8xf32> to vector<2x8x1xf32>
    %222 = vector.broadcast %221 : vector<2x8x1xf32> to vector<2x8x8xf32>
    %223 = arith.subf %219, %222 : vector<2x8x8xf32>
    %224 = math.exp %223 : vector<2x8x8xf32>
    %cst_97 = arith.constant dense<0.000000e+00> : vector<2x8xf32>
    %225 = vector.multi_reduction <add>, %224, %cst_97 [2] : vector<2x8x8xf32> to vector<2x8xf32>
    %226 = vector.shape_cast %225 : vector<2x8xf32> to vector<2x8x1xf32>
    %227 = tpu.reciprocal %226 {approx = true} : vector<2x8x1xf32> -> vector<2x8x1xf32>
    %228 = vector.broadcast %227 : vector<2x8x1xf32> to vector<2x8x8xf32>
    %229 = arith.mulf %224, %228 : vector<2x8x8xf32>
    "tpu.trace_start"() <{level = 10 : i32, message = "bqk,bkd->bqd"}> : () -> ()
    %cst_98 = arith.constant dense<0.000000e+00> : vector<2x8x16xf32>
    %230 = tpu.matmul %229, %217, %cst_98 {dimension_numbers = #tpu.dot_dimension_numbers<[2], [1], [1], [2], [0, 0, 0, 1, 1, 2], [0], [0]>} : vector<2x8x8xf32>, vector<2x8x16xf32>, vector<2x8x16xf32> -> vector<2x8x16xf32>
    "tpu.trace_stop"() : () -> ()
    %231 = vector.shape_cast %230 : vector<2x8x16xf32> to vector<16x16xf32>
    %c1_99 = arith.constant 1 : index
    %c16_100 = arith.constant 16 : index
    %c0_101 = arith.constant 0 : index
    %232 = vector.load %arg6[%c1_99, %c16_100, %c0_101] : memref<2x33x32xf32, #tpu.memory_space<vmem>>, vector<1x16x32xf32>
    %233 = vector.shape_cast %232 : vector<1x16x32xf32> to vector<16x32xf32>
    %cst_102 = arith.constant dense<0.000000e+00> : vector<16x32xf32>
    %234 = tpu.matmul %231, %233, %cst_102 {dimension_numbers = #tpu.dot_dimension_numbers<[1], [0], [0], [1], [0, 0, 1, 1], [], []>} : vector<16x16xf32>, vector<16x32xf32>, vector<16x32xf32> -> vector<16x32xf32>
    %235 = arith.addf %209, %234 : vector<16x32xf32>
    %c1_103 = arith.constant 1 : index
    %c32_104 = arith.constant 32 : index
    %c0_105 = arith.constant 0 : index
    %236 = vector.load %arg6[%c1_103, %c32_104, %c0_105] : memref<2x33x32xf32, #tpu.memory_space<vmem>>, vector<1x1x32xf32>
    %237 = vector.shape_cast %236 : vector<1x1x32xf32> to vector<1x32xf32>
    %238 = vector.broadcast %237 : vector<1x32xf32> to vector<16x32xf32>
    %239 = arith.addf %235, %238 : vector<16x32xf32>
    %240 = arith.addf %239, %175 : vector<16x32xf32>
    %c6 = arith.constant 6 : index
    %c0_106 = arith.constant 0 : index
    %241 = vector.load %arg4[%c6, %c0_106] : memref<10x32xf32, #tpu.memory_space<vmem>>, vector<1x32xf32>
    %c7 = arith.constant 7 : index
    %c0_107 = arith.constant 0 : index
    %242 = vector.load %arg4[%c7, %c0_107] : memref<10x32xf32, #tpu.memory_space<vmem>>, vector<1x32xf32>
    %cst_108 = arith.constant dense<0.000000e+00> : vector<16xf32>
    %243 = vector.multi_reduction <add>, %240, %cst_108 [1] : vector<16x32xf32> to vector<16xf32>
    %244 = vector.shape_cast %243 : vector<16xf32> to vector<16x1xf32>
    %cst_109 = arith.constant 3.200000e+01 : f32
    %245 = vector.broadcast %cst_109 : f32 to vector<16x1xf32>
    %246 = arith.divf %244, %245 : vector<16x1xf32>
    %247 = vector.broadcast %246 : vector<16x1xf32> to vector<16x32xf32>
    %248 = arith.subf %240, %247 : vector<16x32xf32>
    %249 = arith.mulf %248, %248 : vector<16x32xf32>
    %cst_110 = arith.constant dense<0.000000e+00> : vector<16xf32>
    %250 = vector.multi_reduction <add>, %249, %cst_110 [1] : vector<16x32xf32> to vector<16xf32>
    %251 = vector.shape_cast %250 : vector<16xf32> to vector<16x1xf32>
    %cst_111 = arith.constant 3.200000e+01 : f32
    %252 = vector.broadcast %cst_111 : f32 to vector<16x1xf32>
    %253 = arith.divf %251, %252 : vector<16x1xf32>
    %cst_112 = arith.constant 9.99999996E-13 : f32
    %254 = vector.broadcast %cst_112 : f32 to vector<16x1xf32>
    %255 = arith.addf %253, %254 : vector<16x1xf32>
    %256 = math.rsqrt %255 : vector<16x1xf32>
    %257 = vector.broadcast %256 : vector<16x1xf32> to vector<16x32xf32>
    %258 = arith.mulf %248, %257 : vector<16x32xf32>
    %259 = vector.broadcast %241 : vector<1x32xf32> to vector<16x32xf32>
    %260 = arith.mulf %258, %259 : vector<16x32xf32>
    %261 = vector.broadcast %242 : vector<1x32xf32> to vector<16x32xf32>
    %262 = arith.addf %260, %261 : vector<16x32xf32>
    %c1_113 = arith.constant 1 : index
    %c0_114 = arith.constant 0 : index
    %c0_115 = arith.constant 0 : index
    %263 = vector.load %arg7[%c1_113, %c0_114, %c0_115] : memref<2x33x64xf32, #tpu.memory_space<vmem>>, vector<1x32x64xf32>
    %264 = vector.shape_cast %263 : vector<1x32x64xf32> to vector<32x64xf32>
    %cst_116 = arith.constant dense<0.000000e+00> : vector<16x64xf32>
    %265 = tpu.matmul %262, %264, %cst_116 {dimension_numbers = #tpu.dot_dimension_numbers<[1], [0], [0], [1], [0, 0, 1, 1], [], []>} : vector<16x32xf32>, vector<32x64xf32>, vector<16x64xf32> -> vector<16x64xf32>
    %c1_117 = arith.constant 1 : index
    %c32_118 = arith.constant 32 : index
    %c0_119 = arith.constant 0 : index
    %266 = vector.load %arg7[%c1_117, %c32_118, %c0_119] : memref<2x33x64xf32, #tpu.memory_space<vmem>>, vector<1x1x64xf32>
    %267 = vector.shape_cast %266 : vector<1x1x64xf32> to vector<1x64xf32>
    %268 = vector.broadcast %267 : vector<1x64xf32> to vector<16x64xf32>
    %269 = arith.addf %265, %268 : vector<16x64xf32>
    %cst_120 = arith.constant 5.000000e-01 : f32
    %270 = vector.broadcast %cst_120 : f32 to vector<16x64xf32>
    %271 = arith.mulf %270, %269 : vector<16x64xf32>
    %cst_121 = arith.constant 0.707106769 : f32
    %272 = vector.broadcast %cst_121 : f32 to vector<16x64xf32>
    %273 = arith.mulf %269, %272 : vector<16x64xf32>
    %274 = math.erf %273 : vector<16x64xf32>
    %cst_122 = arith.constant 1.000000e+00 : f32
    %275 = vector.broadcast %cst_122 : f32 to vector<16x64xf32>
    %276 = arith.addf %275, %274 : vector<16x64xf32>
    %277 = arith.mulf %271, %276 : vector<16x64xf32>
    %c1_123 = arith.constant 1 : index
    %c0_124 = arith.constant 0 : index
    %c0_125 = arith.constant 0 : index
    %278 = vector.load %arg8[%c1_123, %c0_124, %c0_125] : memref<2x65x32xf32, #tpu.memory_space<vmem>>, vector<1x64x32xf32>
    %279 = vector.shape_cast %278 : vector<1x64x32xf32> to vector<64x32xf32>
    %cst_126 = arith.constant dense<0.000000e+00> : vector<16x32xf32>
    %280 = tpu.matmul %277, %279, %cst_126 {dimension_numbers = #tpu.dot_dimension_numbers<[1], [0], [0], [1], [0, 0, 1, 1], [], []>} : vector<16x64xf32>, vector<64x32xf32>, vector<16x32xf32> -> vector<16x32xf32>
    %c1_127 = arith.constant 1 : index
    %c64_128 = arith.constant 64 : index
    %c0_129 = arith.constant 0 : index
    %281 = vector.load %arg8[%c1_127, %c64_128, %c0_129] : memref<2x65x32xf32, #tpu.memory_space<vmem>>, vector<1x1x32xf32>
    %282 = vector.shape_cast %281 : vector<1x1x32xf32> to vector<1x32xf32>
    %283 = vector.broadcast %282 : vector<1x32xf32> to vector<16x32xf32>
    %284 = arith.addf %280, %283 : vector<16x32xf32>
    %285 = arith.addf %284, %262 : vector<16x32xf32>
    %c8 = arith.constant 8 : index
    %c0_130 = arith.constant 0 : index
    %286 = vector.load %arg4[%c8, %c0_130] : memref<10x32xf32, #tpu.memory_space<vmem>>, vector<1x32xf32>
    %c9 = arith.constant 9 : index
    %c0_131 = arith.constant 0 : index
    %287 = vector.load %arg4[%c9, %c0_131] : memref<10x32xf32, #tpu.memory_space<vmem>>, vector<1x32xf32>
    %cst_132 = arith.constant dense<0.000000e+00> : vector<16xf32>
    %288 = vector.multi_reduction <add>, %285, %cst_132 [1] : vector<16x32xf32> to vector<16xf32>
    %289 = vector.shape_cast %288 : vector<16xf32> to vector<16x1xf32>
    %cst_133 = arith.constant 3.200000e+01 : f32
    %290 = vector.broadcast %cst_133 : f32 to vector<16x1xf32>
    %291 = arith.divf %289, %290 : vector<16x1xf32>
    %292 = vector.broadcast %291 : vector<16x1xf32> to vector<16x32xf32>
    %293 = arith.subf %285, %292 : vector<16x32xf32>
    %294 = arith.mulf %293, %293 : vector<16x32xf32>
    %cst_134 = arith.constant dense<0.000000e+00> : vector<16xf32>
    %295 = vector.multi_reduction <add>, %294, %cst_134 [1] : vector<16x32xf32> to vector<16xf32>
    %296 = vector.shape_cast %295 : vector<16xf32> to vector<16x1xf32>
    %cst_135 = arith.constant 3.200000e+01 : f32
    %297 = vector.broadcast %cst_135 : f32 to vector<16x1xf32>
    %298 = arith.divf %296, %297 : vector<16x1xf32>
    %cst_136 = arith.constant 9.99999996E-13 : f32
    %299 = vector.broadcast %cst_136 : f32 to vector<16x1xf32>
    %300 = arith.addf %298, %299 : vector<16x1xf32>
    %301 = math.rsqrt %300 : vector<16x1xf32>
    %302 = vector.broadcast %301 : vector<16x1xf32> to vector<16x32xf32>
    %303 = arith.mulf %293, %302 : vector<16x32xf32>
    %304 = vector.broadcast %286 : vector<1x32xf32> to vector<16x32xf32>
    %305 = arith.mulf %303, %304 : vector<16x32xf32>
    %306 = vector.broadcast %287 : vector<1x32xf32> to vector<16x32xf32>
    %307 = arith.addf %305, %306 : vector<16x32xf32>
    %308 = vector.shape_cast %307 : vector<16x32xf32> to vector<2x8x32xf32>
    %309 = vector.extract_strided_slice %308 {offsets = [0, 0, 0], sizes = [2, 1, 32], strides = [1, 1, 1]} : vector<2x8x32xf32> to vector<2x1x32xf32>
    %310 = vector.shape_cast %309 : vector<2x1x32xf32> to vector<2x32xf32>
    %c0_137 = arith.constant 0 : index
    %c0_138 = arith.constant 0 : index
    %311 = vector.load %arg9[%c0_137, %c0_138] : memref<32x16xf32, #tpu.memory_space<vmem>>, vector<32x16xf32>
    %cst_139 = arith.constant dense<0.000000e+00> : vector<2x16xf32>
    %312 = tpu.matmul %310, %311, %cst_139 {dimension_numbers = #tpu.dot_dimension_numbers<[1], [0], [0], [1], [0, 0, 1, 1], [], []>} : vector<2x32xf32>, vector<32x16xf32>, vector<2x16xf32> -> vector<2x16xf32>
    %c0_140 = arith.constant 0 : index
    %c0_141 = arith.constant 0 : index
    %313 = vector.load %arg13[%c0_140, %c0_141] : memref<3x16xf32, #tpu.memory_space<vmem>>, vector<1x16xf32>
    %314 = vector.broadcast %313 : vector<1x16xf32> to vector<2x16xf32>
    %315 = arith.addf %312, %314 : vector<2x16xf32>
    %316 = math.tanh %315 : vector<2x16xf32>
    %c0_142 = arith.constant 0 : index
    %c0_143 = arith.constant 0 : index
    %317 = vector.load %arg10[%c0_142, %c0_143] : memref<16x16xf32, #tpu.memory_space<vmem>>, vector<16x16xf32>
    %cst_144 = arith.constant dense<0.000000e+00> : vector<2x16xf32>
    %318 = tpu.matmul %316, %317, %cst_144 {dimension_numbers = #tpu.dot_dimension_numbers<[1], [0], [0], [1], [0, 0, 1, 1], [], []>} : vector<2x16xf32>, vector<16x16xf32>, vector<2x16xf32> -> vector<2x16xf32>
    %c0_145 = arith.constant 0 : index
    %c0_146 = arith.constant 0 : index
    %319 = vector.load %arg2[%c0_145, %c0_146] : memref<2x4xf32, #tpu.memory_space<vmem>>, vector<2x4xf32>
    %c0_147 = arith.constant 0 : index
    %c0_148 = arith.constant 0 : index
    %320 = vector.load %arg11[%c0_147, %c0_148] : memref<4x16xf32, #tpu.memory_space<vmem>>, vector<4x16xf32>
    %cst_149 = arith.constant dense<0.000000e+00> : vector<2x16xf32>
    %321 = tpu.matmul %319, %320, %cst_149 {dimension_numbers = #tpu.dot_dimension_numbers<[1], [0], [0], [1], [0, 0, 1, 1], [], []>} : vector<2x4xf32>, vector<4x16xf32>, vector<2x16xf32> -> vector<2x16xf32>
    %322 = arith.addf %318, %321 : vector<2x16xf32>
    %c1_150 = arith.constant 1 : index
    %c0_151 = arith.constant 0 : index
    %323 = vector.load %arg13[%c1_150, %c0_151] : memref<3x16xf32, #tpu.memory_space<vmem>>, vector<1x16xf32>
    %324 = vector.broadcast %323 : vector<1x16xf32> to vector<2x16xf32>
    %325 = arith.addf %322, %324 : vector<2x16xf32>
    %326 = math.tanh %325 : vector<2x16xf32>
    %c0_152 = arith.constant 0 : index
    %c0_153 = arith.constant 0 : index
    %327 = vector.load %arg12[%c0_152, %c0_153] : memref<16x1xf32, #tpu.memory_space<vmem>>, vector<16x1xf32>
    %cst_154 = arith.constant dense<0.000000e+00> : vector<2x1xf32>
    %328 = tpu.matmul %326, %327, %cst_154 {dimension_numbers = #tpu.dot_dimension_numbers<[1], [0], [0], [1], [0, 0, 1, 1], [], []>} : vector<2x16xf32>, vector<16x1xf32>, vector<2x1xf32> -> vector<2x1xf32>
    %c2_155 = arith.constant 2 : index
    %c0_156 = arith.constant 0 : index
    %329 = vector.load %arg13[%c2_155, %c0_156] : memref<3x16xf32, #tpu.memory_space<vmem>>, vector<1x1xf32>
    %330 = vector.broadcast %329 : vector<1x1xf32> to vector<2x1xf32>
    %331 = arith.addf %328, %330 : vector<2x1xf32>
    %c0_157 = arith.constant 0 : index
    %c0_158 = arith.constant 0 : index
    %332 = vector.load %arg14[%c0_157, %c0_158] : memref<2x1xf32, #tpu.memory_space<vmem>>, vector<2x1xf32>
    tpu.vector_store %arg14[%c0_157, %c0_158], %331 {strides = array<i32>} : memref<2x1xf32, #tpu.memory_space<vmem>>, vector<2x1xf32>,
    return
  }
}

</mosaic_0001>

<bundles_post_ra>
// kernel: bert_regression_forward.1
= control target key start
LH: loop header
LB: loop body
LE: loop exit
PB: predicated region body
PF: predicated region fallthrough
CT: control target
= control target key end

     0   :  { %v3484_v0 = vmov 0   ;;  %v3485_v11 = vmov 0.0   ;;  %v49_v12 = vlaneseq  ;;  %vm69_vm0 = vcmask 523264   ;;  %s3487_s30 = smov 96   ;;  %s3489_s18 = smov 80   ;;  %s4052_s0 = inlined_call_operand.vmem [shape: s32[16,1], index: 0, kind: input, shape index: {}]   ;;  %s4053_s3 = inlined_call_operand.vmem [shape: f32[96,32], index: 3, kind: input, shape index: {}]   ;;  %s4054_s5 = inlined_call_operand.vmem [shape: f32[2,33,96], index: 5, kind: input, shape index: {}]   ;;  %s4055_s4 = inlined_call_operand.vmem [shape: f32[10,32], index: 4, kind: input, shape index: {}]   ;;  %s4056_s1 = inlined_call_operand.vmem [shape: f32[2,1,8], index: 1, kind: input, shape index: {}]   ;;  %s4057_s6 = inlined_call_operand.vmem [shape: f32[2,33,32], index: 6, kind: input, shape index: {}]   ;;  %s4058_s7 = inlined_call_operand.vmem [shape: f32[2,33,64], index: 7, kind: input, shape index: {}]   ;;  %s4059_s8 = inlined_call_operand.vmem [shape: f32[2,65,32], index: 8, kind: input, shape index: {}]   ;;  %s4060_s9 = inlined_call_operand.vmem [shape: f32[32,16], index: 9, kind: input, shape index: {}]   ;;  %s4061_s11 = inlined_call_operand.vmem [shape: f32[4,16], index: 11, kind: input, shape index: {}]   ;;  %s4062_s10 = inlined_call_operand.vmem [shape: f32[16,16], index: 10, kind: input, shape index: {}]   ;;  %s4063_s2 = inlined_call_operand.vmem [shape: f32[2,4], index: 2, kind: input, shape index: {}]   ;;  %s4064_s13 = inlined_call_operand.vmem [shape: f32[3,16], index: 13, kind: input, shape index: {}]   ;;  %s4065_s12 = inlined_call_operand.vmem [shape: f32[16,1], index: 12, kind: input, shape index: {}]   ;;  %s4066_s14 = inlined_call_operand.vmem [shape: f32[2,1], index: 14, kind: output, shape index: {}]  }
   0x1   :  { %3419 = vset.pattern.permute.xlu0 %v3484_v0  ;;  %v47_v1 = vld [vmem:[%s4052_s0] sm:$0xff]  ;;  %v68_v2 = vld [vmem:[%s4053_s3 + $0x38] sm:$0xff]  ;;  %v67_v3 = vld [vmem:[%s4053_s3 + $0x30] sm:$0xff]  ;;  %vm156_vm3 = vcmask 261120   ;;  %vm3486_vm4 = vmmov 0   ;;  %vm309_vm5 = vcmask 130048  }
   0x2   :  { %52 = vperm.xlu0 %3419, %v47_v1   ;;  %3172 = vmatprep.subr.mxu0 %v68_v2  ;;  %v48_v4 = vld [vmem:[%s4052_s0 + $0x8] sm:$0xff]  ;;  %v65_v6 = vld [vmem:[%s4053_s3 + $0x20] sm:$0xff]  ;;  %v64_v7 = vld [vmem:[%s4053_s3 + $0x18] sm:$0xff]  ;;  %v50_v13 = vand.u32 127, %v49_v12  ;;  %v205_v1 = vshrl.u32 %v49_v12, 7  ;;  %vm463_vm6 = vcmask 64512  }
   0x3   :  { %3173 = vmatpush3.msra.mxu0 %v68_v2  ;;  %v66_v5 = vld [vmem:[%s4053_s3 + $0x28] sm:$0xff]  ;;  %v63_v8 = vld [vmem:[%s4053_s3 + $0x10] sm:$0xff]  ;;  %v61_v10 = vld [vmem:[%s4053_s3] sm:$0xff]  ;;  %s3490_s19 = smov 112   ;;  %s3491_s20 = smov 48   ;;  %vm2638_vm7 = vcmask 1041409  }
   0x4   :  { %3174 = vmatprep.subr.mxu0 %v67_v3  ;;  %v62_v9 = vld [vmem:[%s4053_s3 + $0x8] sm:$0xff]  ;;  %v151_v19 = vld [vmem:[%s4053_s3 + $0x40] sm:$0xff]  ;;  %v217_v35 = vld [vmem:[%s4054_s5 + $0x18] sm:$0xff]  ;;  %vm2721_vm8 = vcmask 1043456   ;;  %vm2717_vm9 = vcmask 31744   ;;  %vm2955_vm10 = vcmask 1024  }
   0x5   :  { %3175 = vmatpush3.msra.mxu0 %v67_v3  ;;  %v216_v36 = vld [vmem:[%s4054_s5 + $0x10] sm:$0xff]  ;;  %3191 = vmatprep.subr.mxu1 %v217_v35  ;;  %v215_v37 = vld [vmem:[%s4054_s5 + $0x8] sm:$0xff]  ;;  %v214_v38 = vld [vmem:[%s4054_s5] sm:$0xff] }
   0x6   :  { %55 = vperm.xlu0 %3419, %v48_v4   ;;  %3176 = vmatprep.subr.mxu0 %v66_v5  ;;  %v2963_v46 = vld [vmem:[%s4055_s4] ss:$0 sm:$0xff]  ;;  %v2964_v48 = vld [vmem:[%s4055_s4 + $0x1] ss:$0 sm:$0xff]  ;;  %v206_v4 = vsub.s32 0, %v205_v1 }
   0x7   :  { %3177 = vmatpush3.msra.mxu0 %v66_v5  ;;  %3192 = vmatpush3.msra.mxu1 %v217_v35  ;;  %v2965_v56 = vld [vmem:[%s4054_s5 + $0x20] ss:$0 sm:$0xff]  ;;  %v197_v3 = vld [vmem:[%s4056_s1 + $0x1] sm:$0x1] }
   0x8   :  { %3178 = vmatprep.subr.mxu0 %v65_v6  ;;  %3193 = vmatprep.subr.mxu1 %v216_v36  ;;  %v196_v0 = vld [vmem:[%s4056_s1] sm:$0x1]  ;;  %s3488_s1 = smov 64  }
   0x9   :  { %3179 = vmatpush3.msra.mxu0 %v65_v6  ;;  %3194 = vmatpush3.msra.mxu1 %v216_v36  ;;  %v198_v2 = vsub.f32 1.0, %v196_v0  ;;  %v199_v6 = vsub.f32 1.0, %v197_v3 }
   0xa   :  { %3180 = vmatprep.subr.mxu0 %v64_v7  ;;  %3195 = vmatprep.subr.mxu1 %v215_v37 }
   0xb   :  { %3181 = vmatpush3.msra.mxu0 %v64_v7  ;;  %3196 = vmatpush3.msra.mxu1 %v215_v37  ;;  %v200_v5 = vmul.f32 -10000.0, %v198_v2 }
   0xc   :  { %3182 = vmatprep.subr.mxu0 %v63_v8  ;;  %3197 = vmatprep.subr.mxu1 %v214_v38 }
   0xd   :  { %3183 = vmatpush3.msra.mxu0 %v63_v8  ;;  %3198 = vmatpush3.msra.mxu1 %v214_v38  ;;  %v3671_v7 = vrot.slane %v200_v5, %v206_v4  ;;  %v201_v8 = vmul.f32 -10000.0, %v199_v6  ;;  %v639_v6 = vld [vmem:[%s4057_s6 + $0x8] sm:$0xff] }
   0xe   :  { %3184 = vmatprep.subr.mxu0 %v62_v9  ;;  %3202 = vmatprep.subr.mxu1 %v3485_v11 }
   0xf   :  { %3185 = vmatpush3.msra.mxu0 %v62_v9 }
  0x10   :  { %3186 = vmatprep.subr.mxu0 %v61_v10 }
  0x11   :  { %3187 = vmatpush3.msra.mxu0 %v61_v10 }
  0x12   :  { %3212 = vmatprep.subr.mxu0 %v3485_v11 }
  0x7d   :  { %v53_v14 = vpop.permute.xlu0 %52 }
  0x7e   :  { %vm57_vm1 = vcmp.eq.s32.totalorder %v50_v13, %v53_v14 }
  0x7f   :  { %v59_v15 = vsel %vm57_vm1, 1.0, %v3485_v11 }
  0x80   :  { %3188 = vmatprep.mubr.msk.f32.mxu0 %vm69_vm0, %v59_v15 }
  0x81   :  { %v56_v16 = vpop.permute.xlu0 %55 }
  0x82   :  { %vm58_vm2 = vcmp.eq.s32.totalorder %v50_v13, %v56_v16  ;;  %v3674_v13 = vrot.slane %v201_v8, %v206_v4 }
  0x83   :  { %v60_v17 = vsel %vm58_vm2, 1.0, %v3485_v11 }
  0x84   :  { %3189 = vmatmul.mubr.msk.f32.vlgmr.msra.gmra.mxu0 %vm69_vm0, %v60_v17 }
  0x85   :  { %3214 = vmatprep.mubr.msk.f32.mxu0 %vm3486_vm4, %v3485_v11 }
 0x144   :  { %v3190_v18 = vpop.f32.mrf.mxu0 }
 0x145   :  { %v153_v22 = vadd.f32 %v3190_v18, %v151_v19 }
 0x146   :  { %v142_v20 = vpop.f32.mrf.mxu0 }
 0x147   :  { %v152_v21 = vadd.f32 %v151_v19, %v142_v20  ;;  %v160_v24 = vsel %vm156_vm3, %v153_v22, 0.0 }
 0x149   :  { %v157_v23 = vsel %vm156_vm3, %v152_v21, 0.0 }
 0x14a   :  { %158 = vadd.xlane.f32.xlu1 %v157_v23 }
 0x14e   :  { %161 = vadd.xlane.f32.xlu1 %v160_v24 }
 0x1d3   :  { %v159_v25 = vpop.xlane.xlu1 %158 }
 0x1d4   :  { %v164_v26 = vmul.f32 0.03125, %v159_v25 }
 0x1d6   :  { %v166_v27 = vsub.f32 %v152_v21, %v164_v26 }
 0x1d7   :  { %v162_v28 = vpop.xlane.xlu1 %161 }
 0x1d8   :  { %v165_v29 = vmul.f32 0.03125, %v162_v28  ;;  %v168_v30 = vmul.f32 %v166_v27, %v166_v27 }
 0x1da   :  { %v167_v31 = vsub.f32 %v153_v22, %v165_v29  ;;  %v170_v32 = vsel %vm156_vm3, %v168_v30, 0.0 }
 0x1db   :  { %171 = vadd.xlane.f32.xlu0 %v170_v32 }
 0x1dc   :  { %v169_v33 = vmul.f32 %v167_v31, %v167_v31 }
 0x1de   :  { %v173_v34 = vsel %vm156_vm3, %v169_v33, 0.0 }
 0x1df   :  { %174 = vadd.xlane.f32.xlu1 %v173_v34 }
 0x264   :  { %v172_v39 = vpop.xlane.xlu0 %171 }
 0x265   :  { %v176_v40 = vmul.f32 0.03125, %v172_v39 }
 0x267   :  { %v178_v41 = vadd.f32 1e-12, %v176_v40 }
 0x268   :  { %v175_v42 = vpop.xlane.xlu1 %174 }
 0x269   :  { %3420 = vrsqrt.f32 %v178_v41  ;;  %v177_v43 = vmul.f32 0.03125, %v175_v42 }
 0x26b   :  { %v179_v44 = vadd.f32 1e-12, %v177_v43 }
 0x26d   :  { %3422 = vrsqrt.f32 %v179_v44 }
 0x276   :  { %v3421_v45 = vpop.eup %3420 }
 0x277   :  { %v182_v47 = vmul.f32 %v3421_v45, %v166_v27 }
 0x279   :  { %v188_v49 = vmul.f32 %v2963_v46, %v182_v47 }
 0x27a   :  { %v3423_v50 = vpop.eup %3422 }
 0x27b   :  { %v183_v51 = vmul.f32 %v3423_v50, %v167_v31  ;;  %v3629_v52 = vadd.f32 %v2964_v48, %v188_v49 }
 0x27d   :  { %v189_v53 = vmul.f32 %v2963_v46, %v183_v51  ;;  %3199 = vmatprep.mubr.msk.f32.mxu1 %vm156_vm3, %v3629_v52 }
 0x27f   :  { %v3633_v54 = vadd.f32 %v2964_v48, %v189_v53 }
 0x281   :  { %3200 = vmatmul.mubr.msk.f32.vlgmr.msra.gmra.mxu1 %vm156_vm3, %v3633_v54 }
 0x282   :  { %3204 = vmatprep.mubr.msk.f32.mxu1 %vm3486_vm4, %v3485_v11 }
 0x341   :  { %v3201_v55 = vpop.f32.mrf.mxu1 }
 0x342   :  { %v3648_v59 = vadd.f32 %v3201_v55, %v2965_v56 }
 0x343   :  { %v295_v57 = vpop.f32.mrf.mxu1 }
 0x344   :  { %v3644_v58 = vadd.f32 %v2965_v56, %v295_v57  ;;  %v305_v63 = vmul.f32 0.25, %v3648_v59 }
 0x346   :  { %307 = vrot.lane.b32.xlu1 %v3644_v58, %s3487_s30  ;;  %v304_v61 = vmul.f32 0.25, %v3644_v58 }
 0x34a   :  { %386 = vrot.lane.b32.xlu1 %v3648_v59, %s3487_s30 }
 0x3b8   :  { %v308_v60 = vpop.permute.xlu1 %307 }
 0x3b9   :  { %3203 = vmatpush3.xpose.msk.msra.mxu1 %vm309_vm5, %v308_v60 }
 0x3ba   :  { %3207 = vmatprep.subr.mxu1 %v3485_v11 }
 0x3bc   :  { %v387_v62 = vpop.permute.xlu1 %386  ;;  %3205 = vmatmul.mubr.msk.f32.vlgmr.msra.gmra.mxu1 %vm309_vm5, %v304_v61 }
 0x3bd   :  { %3208 = vmatpush3.xpose.msk.msra.mxu1 %vm309_vm5, %v387_v62  ;;  %3209 = vmatprep.mubr.msk.f32.mxu1 %vm3486_vm4, %v3485_v11 }
 0x3be   :  { %3217 = vmatprep.subr.mxu1 %v3485_v11 }
 0x3c0   :  { %3210 = vmatmul.mubr.msk.f32.vlgmr.msra.gmra.mxu1 %vm309_vm5, %v305_v63 }
 0x3c1   :  { %3219 = vmatprep.mubr.msk.f32.mxu1 %vm3486_vm4, %v3485_v11 }
 0x47c   :  { %v381_v9 = vpop.f32.mrf.mxu1 }
 0x47d   :  { %v382_v10 = vadd.f32 %v381_v9, %v3671_v7 }
 0x47e   :  { %v3206_v14 = vpop.f32.mrf.mxu1 }
 0x47f   :  { %v464_v12 = vsel %vm463_vm6, %v382_v10, -inf }
 0x480   :  { %465 = vmax.xlane.f32.xlu1 %v464_v12  ;;  %v459_v15 = vpop.f32.mrf.mxu1  ;;  %v971_v12 = vld [vmem:[%s4057_s6 + $0x18] sm:$0xff] }
 0x481   :  { %v460_v16 = vadd.f32 %v459_v15, %v3674_v13  ;;  %v970_v15 = vld [vmem:[%s4057_s6 + $0x10] sm:$0xff] }
 0x482   :  { %v3211_v17 = vpop.f32.mrf.mxu1 }
 0x483   :  { %v467_v18 = vsel %vm463_vm6, %v460_v16, -inf }
 0x484   :  { %468 = vmax.xlane.f32.xlu0 %v467_v18 }
 0x491   :  { %562 = vrot.lane.b32.xlu1 %v3648_v59, %s3488_s1 }
 0x49a   :  { %486 = vrot.lane.b32.xlu0 %v3644_v58, %s3488_s1 }
 0x49e   :  { %642 = vrot.lane.b32.xlu0 %v3644_v58, %s3489_s18 }
 0x4a2   :  { %720 = vrot.lane.b32.xlu0 %v3648_v59, %s3489_s18 }
 0x509   :  { %v466_v19 = vpop.xlane.xlu1 %465 }
 0x50a   :  { %v470_v20 = vsub.f32 %v382_v10, %v466_v19 }
 0x50c   :  { %v472_v21 = vmul.f32 1.442695, %v470_v20 }
 0x50d   :  { %v563_v22 = vpop.permute.xlu1 %562  ;;  %v469_v23 = vpop.xlane.xlu0 %468 }
 0x50e   :  { %3424 = vpow2.f32 %v472_v21  ;;  %v471_v24 = vsub.f32 %v460_v16, %v469_v23  ;;  %3218 = vmatpush3.msra.mxu1 %v563_v22  ;;  %v2984_v22 = vld [vmem:[%s4057_s6 + $0x20] ss:$0 sm:$0xff] }
 0x50f   :  { %3227 = vmatprep.subr.mxu1 %v3485_v11 }
 0x510   :  { %v474_v25 = vmul.f32 1.442695, %v471_v24 }
 0x511   :  { %v487_v26 = vpop.permute.xlu0 %486 }
 0x512   :  { %3426 = vpow2.f32 %v474_v25  ;;  %3213 = vmatpush3.msra.mxu0 %v487_v26 }
 0x513   :  { %3222 = vmatprep.subr.mxu0 %v3485_v11 }
 0x515   :  { %v643_v31 = vpop.permute.xlu0 %642 }
 0x519   :  { %v721_v32 = vpop.permute.xlu0 %720 }
 0x51b   :  { %v3425_v27 = vpop.eup %3424 }
 0x51c   :  { %v476_v28 = vsel %vm463_vm6, %v3425_v27, 0.0 }
 0x51d   :  { %477 = vadd.xlane.f32.xlu0 %v476_v28 }
 0x51f   :  { %v3427_v29 = vpop.eup %3426 }
 0x520   :  { %v479_v30 = vsel %vm463_vm6, %v3427_v29, 0.0 }
 0x521   :  { %480 = vadd.xlane.f32.xlu0 %v479_v30 }
 0x537   :  { %640 = vrot.lane.b32.xlu0 %v304_v61, %s3490_s19 }
 0x53b   :  { %718 = vrot.lane.b32.xlu0 %v305_v63, %s3490_s19 }
 0x5a6   :  { %v478_v33 = vpop.xlane.xlu0 %477 }
 0x5a7   :  { %3428 = vrcp.f32 %v478_v33 }
 0x5aa   :  { %v481_v34 = vpop.xlane.xlu0 %480 }
 0x5ab   :  { %3430 = vrcp.f32 %v481_v34 }
 0x5ae   :  { %v641_v38 = vpop.permute.xlu0 %640 }
 0x5b2   :  { %v719_v40 = vpop.permute.xlu0 %718 }
 0x5b4   :  { %v3429_v35 = vpop.eup %3428 }
 0x5b5   :  { %v484_v36 = vmul.f32 %v3429_v35, %v3425_v27 }
 0x5b7   :  { %3215 = vmatmul.mubr.msk.f32.vlgmr.msra.gmra.mxu0 %vm463_vm6, %v484_v36 }
 0x5b8   :  { %v3431_v37 = vpop.eup %3430  ;;  %3223 = vmatpush3.xpose.msk.msra.mxu0 %vm309_vm5, %v643_v31  ;;  %3224 = vmatprep.mubr.msk.f32.mxu0 %vm3486_vm4, %v3485_v11 }
 0x5b9   :  { %v485_v39 = vmul.f32 %v3431_v37, %v3427_v29  ;;  %3232 = vmatprep.subr.mxu0 %v3485_v11 }
 0x5bb   :  { %3220 = vmatmul.mubr.msk.f32.vlgmr.msra.gmra.mxu1 %vm463_vm6, %v485_v39  ;;  %3225 = vmatmul.mubr.msk.f32.vlgmr.msra.gmra.mxu0 %vm309_vm5, %v641_v38 }
 0x5bc   :  { %3228 = vmatpush3.xpose.msk.msra.mxu1 %vm309_vm5, %v721_v32  ;;  %3229 = vmatprep.mubr.msk.f32.mxu1 %vm3486_vm4, %v3485_v11 }
 0x5bd   :  { %3237 = vmatprep.subr.mxu1 %v3485_v11  ;;  %3234 = vmatprep.mubr.msk.f32.mxu0 %vm3486_vm4, %v3485_v11 }
 0x5bf   :  { %3230 = vmatmul.mubr.msk.f32.vlgmr.msra.gmra.mxu1 %vm309_vm5, %v719_v40 }
 0x5c0   :  { %3239 = vmatprep.mubr.msk.f32.mxu1 %vm3486_vm4, %v3485_v11 }
 0x677   :  { %v558_v41 = vpop.f32.mrf.mxu0 }
 0x679   :  { %v3216_v42 = vpop.f32.mrf.mxu0 }
 0x67a   :  { %v1185_v42 = vld [vmem:[%s4058_s7 + $0x10] sm:$0xff] }
 0x67b   :  { %v634_v43 = vpop.f32.mrf.mxu1  ;;  %v714_v44 = vpop.f32.mrf.mxu0 }
 0x67c   :  { %v715_v45 = vadd.f32 %v714_v44, %v3671_v7  ;;  %v1183_v44 = vld [vmem:[%s4058_s7] sm:$0xff] }
 0x67d   :  { %v3221_v46 = vpop.f32.mrf.mxu1  ;;  %v3226_v47 = vpop.f32.mrf.mxu0 }
 0x67e   :  { %v796_v48 = vsel %vm463_vm6, %v715_v45, -inf }
 0x67f   :  { %797 = vmax.xlane.f32.xlu1 %v796_v48  ;;  %v792_v49 = vpop.f32.mrf.mxu1 }
 0x680   :  { %v793_v50 = vadd.f32 %v792_v49, %v3674_v13 }
 0x681   :  { %v3231_v51 = vpop.f32.mrf.mxu1 }
 0x682   :  { %v799_v53 = vsel %vm463_vm6, %v793_v50, -inf }
 0x683   :  { %800 = vmax.xlane.f32.xlu0 %v799_v53  ;;  %v2985_v53 = vld [vmem:[%s4055_s4 + $0x2] ss:$0 sm:$0xff] }
 0x708   :  { %v798_v55 = vpop.xlane.xlu1 %797 }
 0x709   :  { %v802_v56 = vsub.f32 %v715_v45, %v798_v55 }
 0x70b   :  { %v804_v57 = vmul.f32 1.442695, %v802_v56 }
 0x70c   :  { %v801_v60 = vpop.xlane.xlu0 %800 }
 0x70d   :  { %3432 = vpow2.f32 %v804_v57  ;;  %v803_v61 = vsub.f32 %v793_v50, %v801_v60 }
 0x70f   :  { %v806_v62 = vmul.f32 1.442695, %v803_v61  ;;  %v2986_v61 = vld [vmem:[%s4055_s4 + $0x3] ss:$0 sm:$0xff] }
 0x711   :  { %3434 = vpow2.f32 %v806_v62 }
 0x71a   :  { %v3433_v63 = vpop.eup %3432 }
 0x71b   :  { %v808_v0 = vsel %vm463_vm6, %v3433_v63, 0.0 }
 0x71c   :  { %809 = vadd.xlane.f32.xlu0 %v808_v0 }
 0x71e   :  { %v3435_v1 = vpop.eup %3434 }
 0x71f   :  { %v811_v2 = vsel %vm463_vm6, %v3435_v1, 0.0 }
 0x720   :  { %812 = vadd.xlane.f32.xlu1 %v811_v2  ;;  %v1289_v2 = vld [vmem:[%s4059_s8 + $0x30] sm:$0xff] }
 0x731   :  { %894 = vrot.lane.b32.xlu1 %v3648_v59, %s3491_s20 }
 0x732   :  { %818 = vrot.lane.b32.xlu0 %v3644_v58, %s3491_s20  ;;  %v638_v58 = vld [vmem:[%s4057_s6] sm:$0xff] }
 0x7a5   :  { %v810_v3 = vpop.xlane.xlu0 %809 }
 0x7a6   :  { %3436 = vrcp.f32 %v810_v3  ;;  %v1288_v3 = vld [vmem:[%s4059_s8 + $0x28] sm:$0xff] }
 0x7a9   :  { %v813_v4 = vpop.xlane.xlu1 %812  ;;  %v819_v5 = vpop.permute.xlu0 %818 }
 0x7aa   :  { %3438 = vrcp.f32 %v813_v4  ;;  %3233 = vmatpush3.msra.mxu0 %v819_v5  ;;  %v1287_v4 = vld [vmem:[%s4059_s8 + $0x20] sm:$0xff]  ;;  %v1286_v5 = vld [vmem:[%s4059_s8 + $0x18] sm:$0xff] }
 0x7ab   :  { %3242 = vmatprep.subr.mxu0 %v971_v12 }
 0x7ad   :  { %v895_v8 = vpop.permute.xlu1 %894 }
 0x7ae   :  { %3238 = vmatpush3.msra.mxu1 %v895_v8  ;;  %v1284_v8 = vld [vmem:[%s4059_s8 + $0x8] sm:$0xff] }
 0x7af   :  { %3249 = vmatprep.subr.mxu1 %v639_v6 }
 0x7b3   :  { %v3437_v9 = vpop.eup %3436 }
 0x7b4   :  { %v816_v10 = vmul.f32 %v3437_v9, %v3433_v63  ;;  %v1283_v9 = vld [vmem:[%s4059_s8] sm:$0xff] }
 0x7b6   :  { %3235 = vmatmul.mubr.msk.f32.vlgmr.msra.gmra.mxu0 %vm463_vm6, %v816_v10  ;;  %v2987_v10 = vld [vmem:[%s4058_s7 + $0x20] ss:$0 sm:$0xff] }
 0x7b7   :  { %v3439_v59 = vpop.eup %3438  ;;  %3243 = vmatpush3.msra.mxu0 %v971_v12 }
 0x7b8   :  { %v817_v14 = vmul.f32 %v3439_v59, %v3435_v1  ;;  %3244 = vmatprep.subr.mxu0 %v970_v15  ;;  %v1290_v1 = vld [vmem:[%s4059_s8 + $0x38] sm:$0xff] }
 0x7b9   :  { %3245 = vmatpush3.msra.mxu0 %v970_v15 }
 0x7ba   :  { %3240 = vmatmul.mubr.msk.f32.vlgmr.msra.gmra.mxu1 %vm463_vm6, %v817_v14 }
 0x7bb   :  { %3250 = vmatpush3.msra.mxu1 %v639_v6  ;;  %3253 = vmatprep.mubr.msk.f32.mxu1 %vm309_vm5, %v558_v41  ;;  %v1285_v6 = vld [vmem:[%s4059_s8 + $0x10] sm:$0xff] }
 0x7bc   :  { %3251 = vmatprep.subr.mxu1 %v638_v58 }
 0x7bd   :  { %3252 = vmatpush3.msra.mxu1 %v638_v58 }
 0x7be   :  { %3254 = vmatmul.mubr.msk.f32.vlgmr.msra.gmra.mxu1 %vm309_vm5, %v634_v43  ;;  %v1184_v43 = vld [vmem:[%s4058_s7 + $0x8] sm:$0xff]  ;;  %3267 = vmatprep.subr.mxu1 %v1290_v1 }
 0x7bf   :  { %3268 = vmatpush3.msra.mxu1 %v1290_v1 }
 0x7c0   :  { %3269 = vmatprep.subr.mxu1 %v1289_v2 }
 0x7c1   :  { %3270 = vmatpush3.msra.mxu1 %v1289_v2  ;;  %v3000_v2 = vld [vmem:[%s4054_s5 + $0x48] ss:$0 sm:$0xff] }
 0x7c2   :  { %3271 = vmatprep.subr.mxu1 %v1288_v3 }
 0x7c3   :  { %3272 = vmatpush3.msra.mxu1 %v1288_v3 }
 0x7c4   :  { %3273 = vmatprep.subr.mxu1 %v1287_v4 }
 0x7c5   :  { %3274 = vmatpush3.msra.mxu1 %v1287_v4 }
 0x7c6   :  { %3275 = vmatprep.subr.mxu1 %v1286_v5 }
 0x7c7   :  { %3276 = vmatpush3.msra.mxu1 %v1286_v5 }
 0x7c8   :  { %3277 = vmatprep.subr.mxu1 %v1285_v6 }
 0x7c9   :  { %3278 = vmatpush3.msra.mxu1 %v1285_v6 }
 0x7ca   :  { %3279 = vmatprep.subr.mxu1 %v1284_v8 }
 0x7cb   :  { %3280 = vmatpush3.msra.mxu1 %v1284_v8 }
 0x7cc   :  { %3281 = vmatprep.subr.mxu1 %v1283_v9 }
 0x7cd   :  { %3282 = vmatpush3.msra.mxu1 %v1283_v9 }
 0x7ce   :  { %3302 = vmatprep.subr.mxu1 %v3485_v11 }
 0x876   :  { %v890_v16 = vpop.f32.mrf.mxu0 }
 0x877   :  { %3246 = vmatprep.mubr.msk.f32.mxu0 %vm309_vm5, %v890_v16 }
 0x878   :  { %v3236_v17 = vpop.f32.mrf.mxu0 }
 0x87a   :  { %v966_v18 = vpop.f32.mrf.mxu1 }
 0x87b   :  { %3247 = vmatmul.mubr.msk.f32.vlgmr.msra.gmra.mxu0 %vm309_vm5, %v966_v18 }
 0x87c   :  { %v3241_v19 = vpop.f32.mrf.mxu1 }
 0x87e   :  { %v3255_v20 = vpop.f32.mrf.mxu1 }
 0x880   :  { %v1125_v24 = vpop.f32.mrf.mxu1 }
 0x93b   :  { %v3248_v21 = vpop.f32.mrf.mxu0 }
 0x93c   :  { %v1131_v23 = vadd.f32 %v3255_v20, %v3248_v21 }
 0x93d   :  { %v1044_v25 = vpop.f32.mrf.mxu0 }
 0x93e   :  { %v1140_v26 = vadd.f32 %v2984_v22, %v1131_v23  ;;  %v1126_v27 = vadd.f32 %v1125_v24, %v1044_v25  ;;  %v2990_v25 = vld [vmem:[%s4059_s8 + $0x40] ss:$0 sm:$0xff] }
 0x940   :  { %v1139_v28 = vadd.f32 %v2984_v22, %v1126_v27  ;;  %v1142_v29 = vadd.f32 %v1140_v26, %v3633_v54 }
 0x942   :  { %v1148_v30 = vsel %vm156_vm3, %v1142_v29, 0.0  ;;  %v1141_v31 = vadd.f32 %v1139_v28, %v3629_v52  ;;  %v1186_v52 = vld [vmem:[%s4058_s7 + $0x18] sm:$0xff] }
 0x943   :  { %1149 = vadd.xlane.f32.xlu0 %v1148_v30  ;;  %3256 = vmatprep.subr.mxu0 %v1186_v52 }
 0x944   :  { %v1145_v32 = vsel %vm156_vm3, %v1141_v31, 0.0  ;;  %3257 = vmatpush3.msra.mxu0 %v1186_v52 }
 0x945   :  { %1146 = vadd.xlane.f32.xlu1 %v1145_v32  ;;  %3258 = vmatprep.subr.mxu0 %v1185_v42 }
 0x946   :  { %3259 = vmatpush3.msra.mxu0 %v1185_v42  ;;  %v2998_v42 = vld [vmem:[%s4054_s5 + $0x40] sm:$0xff] }
 0x947   :  { %3260 = vmatprep.subr.mxu0 %v1184_v43 }
 0x948   :  { %3261 = vmatpush3.msra.mxu0 %v1184_v43  ;;  %v2997_v43 = vld [vmem:[%s4054_s5 + $0x38] sm:$0xff] }
 0x949   :  { %3262 = vmatprep.subr.mxu0 %v1183_v44 }
 0x94a   :  { %3263 = vmatpush3.msra.mxu0 %v1183_v44  ;;  %v2996_v44 = vld [vmem:[%s4054_s5 + $0x30] sm:$0xff] }
 0x94b   :  { %3286 = vmatprep.subr.mxu0 %v2998_v42 }
 0x9cc   :  { %v1150_v33 = vpop.xlane.xlu0 %1149 }
 0x9cd   :  { %v1152_v34 = vmul.f32 0.03125, %v1150_v33 }
 0x9ce   :  { %v1147_v35 = vpop.xlane.xlu1 %1146 }
 0x9cf   :  { %v1154_v36 = vsub.f32 %v1142_v29, %v1152_v34  ;;  %v1151_v37 = vmul.f32 0.03125, %v1147_v35 }
 0x9d1   :  { %v1153_v38 = vsub.f32 %v1141_v31, %v1151_v37  ;;  %v1156_v39 = vmul.f32 %v1154_v36, %v1154_v36 }
 0x9d3   :  { %v1160_v40 = vsel %vm156_vm3, %v1156_v39, 0.0  ;;  %v1155_v41 = vmul.f32 %v1153_v38, %v1153_v38 }
 0x9d4   :  { %1161 = vadd.xlane.f32.xlu1 %v1160_v40 }
 0x9d5   :  { %v1157_v54 = vsel %vm156_vm3, %v1155_v41, 0.0 }
 0x9d6   :  { %1158 = vadd.xlane.f32.xlu0 %v1157_v54 }
 0xa5d   :  { %v1162_v45 = vpop.xlane.xlu1 %1161 }
 0xa5e   :  { %v1164_v46 = vmul.f32 0.03125, %v1162_v45  ;;  %v2995_v45 = vld [vmem:[%s4054_s5 + $0x28] sm:$0xff] }
 0xa5f   :  { %v1159_v47 = vpop.xlane.xlu0 %1158 }
 0xa60   :  { %v1166_v48 = vadd.f32 1e-12, %v1164_v46  ;;  %v1163_v49 = vmul.f32 0.03125, %v1159_v47 }
 0xa62   :  { %3440 = vrsqrt.f32 %v1166_v48  ;;  %v1165_v50 = vadd.f32 1e-12, %v1163_v49 }
 0xa64   :  { %3442 = vrsqrt.f32 %v1165_v50 }
 0xa6f   :  { %v3441_v51 = vpop.eup %3440 }
 0xa70   :  { %v1170_v55 = vmul.f32 %v3441_v51, %v1154_v36 }
 0xa71   :  { %v3443_v56 = vpop.eup %3442 }
 0xa72   :  { %v1169_v57 = vmul.f32 %v3443_v56, %v1153_v38  ;;  %v1176_v60 = vmul.f32 %v2985_v53, %v1170_v55  ;;  %v2993_v55 = vld [vmem:[%s4055_s4 + $0x4] ss:$0 sm:$0xff] }
 0xa74   :  { %v1175_v62 = vmul.f32 %v2985_v53, %v1169_v57  ;;  %v1182_v0 = vadd.f32 %v2986_v61, %v1176_v60 }
 0xa76   :  { %v1181_v63 = vadd.f32 %v2986_v61, %v1175_v62  ;;  %v2994_v62 = vld [vmem:[%s4055_s4 + $0x5] ss:$0 sm:$0xff] }
 0xa78   :  { %3264 = vmatprep.mubr.msk.f32.mxu0 %vm156_vm3, %v1181_v63 }
 0xa79   :  { %3265 = vmatmul.mubr.msk.f32.vlgmr.msra.gmra.mxu0 %vm156_vm3, %v1182_v0 }
 0xa7a   :  { %3287 = vmatpush3.msra.mxu0 %v2998_v42 }
 0xa7b   :  { %3288 = vmatprep.subr.mxu0 %v2997_v43 }
 0xa7c   :  { %3289 = vmatpush3.msra.mxu0 %v2997_v43 }
 0xa7d   :  { %3290 = vmatprep.subr.mxu0 %v2996_v44 }
 0xa7e   :  { %3291 = vmatpush3.msra.mxu0 %v2996_v44 }
 0xa7f   :  { %3292 = vmatprep.subr.mxu0 %v2995_v45 }
 0xa80   :  { %3293 = vmatpush3.msra.mxu0 %v2995_v45 }
 0xa81   :  { %3297 = vmatprep.subr.mxu0 %v3485_v11 }
 0xb39   :  { %v3266_v59 = vpop.f32.mrf.mxu0 }
 0xb3a   :  { %v1270_v14 = vadd.f32 %v3266_v59, %v2987_v10 }
 0xb3b   :  { %v1264_v58 = vpop.f32.mrf.mxu0 }
 0xb3c   :  { %v1276_v12 = vmul.f32 0.70710677, %v1270_v14  ;;  %v1265_v15 = vadd.f32 %v2987_v10, %v1264_v58  ;;  %v1274_v22 = vmul.f32 0.5, %v1270_v14 }
 0xb3e   :  { %3444 = verf.f32 %v1276_v12  ;;  %v1275_v16 = vmul.f32 0.70710677, %v1265_v15  ;;  %v1273_v20 = vmul.f32 0.5, %v1265_v15 }
 0xb40   :  { %3446 = verf.f32 %v1275_v16 }
 0xb4b   :  { %v3445_v17 = vpop.eup %3444 }
 0xb4c   :  { %v1280_v19 = vadd.f32 1.0, %v3445_v17 }
 0xb4d   :  { %v3447_v18 = vpop.eup %3446 }
 0xb4e   :  { %v1279_v21 = vadd.f32 1.0, %v3447_v18  ;;  %v1282_v24 = vmul.f32 %v1280_v19, %v1274_v22 }
 0xb50   :  { %v1281_v23 = vmul.f32 %v1279_v21, %v1273_v20 }
 0xb52   :  { %3283 = vmatprep.mubr.msk.f32.mxu1 %vm69_vm0, %v1281_v23 }
 0xb53   :  { %3284 = vmatmul.mubr.msk.f32.vlgmr.msra.gmra.mxu1 %vm69_vm0, %v1282_v24 }
 0xb54   :  { %3304 = vmatprep.mubr.msk.f32.mxu1 %vm3486_vm4, %v3485_v11 }
 0xc13   :  { %v3285_v26 = vpop.f32.mrf.mxu1 }
 0xc14   :  { %v1374_v27 = vadd.f32 %v3285_v26, %v2990_v25 }
 0xc15   :  { %v1368_v28 = vpop.f32.mrf.mxu1 }
 0xc16   :  { %v1369_v29 = vadd.f32 %v2990_v25, %v1368_v28  ;;  %v1378_v30 = vadd.f32 %v1374_v27, %v1182_v0 }
 0xc18   :  { %v1384_v31 = vsel %vm156_vm3, %v1378_v30, 0.0  ;;  %v1377_v32 = vadd.f32 %v1369_v29, %v1181_v63 }
 0xc19   :  { %1385 = vadd.xlane.f32.xlu1 %v1384_v31 }
 0xc1a   :  { %v1381_v33 = vsel %vm156_vm3, %v1377_v32, 0.0 }
 0xc1b   :  { %1382 = vadd.xlane.f32.xlu0 %v1381_v33 }
 0xca2   :  { %v1386_v34 = vpop.xlane.xlu1 %1385 }
 0xca3   :  { %v1388_v35 = vmul.f32 0.03125, %v1386_v34 }
 0xca4   :  { %v1383_v36 = vpop.xlane.xlu0 %1382 }
 0xca5   :  { %v1390_v37 = vsub.f32 %v1378_v30, %v1388_v35  ;;  %v1387_v38 = vmul.f32 0.03125, %v1383_v36 }
 0xca7   :  { %v1389_v39 = vsub.f32 %v1377_v32, %v1387_v38  ;;  %v1392_v40 = vmul.f32 %v1390_v37, %v1390_v37 }
 0xca9   :  { %v1396_v41 = vsel %vm156_vm3, %v1392_v40, 0.0  ;;  %v1391_v54 = vmul.f32 %v1389_v39, %v1389_v39 }
 0xcaa   :  { %1397 = vadd.xlane.f32.xlu1 %v1396_v41 }
 0xcab   :  { %v1393_v52 = vsel %vm156_vm3, %v1391_v54, 0.0 }
 0xcac   :  { %1394 = vadd.xlane.f32.xlu0 %v1393_v52 }
 0xd33   :  { %v1398_v46 = vpop.xlane.xlu1 %1397 }
 0xd34   :  { %v1400_v47 = vmul.f32 0.03125, %v1398_v46 }
 0xd35   :  { %v1395_v48 = vpop.xlane.xlu0 %1394 }
 0xd36   :  { %v1402_v49 = vadd.f32 1e-12, %v1400_v47  ;;  %v1399_v50 = vmul.f32 0.03125, %v1395_v48 }
 0xd38   :  { %3448 = vrsqrt.f32 %v1402_v49  ;;  %v1401_v51 = vadd.f32 1e-12, %v1399_v50 }
 0xd3a   :  { %3450 = vrsqrt.f32 %v1401_v51 }
 0xd45   :  { %v3449_v53 = vpop.eup %3448 }
 0xd46   :  { %v1406_v56 = vmul.f32 %v3449_v53, %v1390_v37 }
 0xd47   :  { %v3451_v57 = vpop.eup %3450 }
 0xd48   :  { %v1405_v60 = vmul.f32 %v3451_v57, %v1389_v39  ;;  %v1412_v61 = vmul.f32 %v2993_v55, %v1406_v56 }
 0xd4a   :  { %v1411_v63 = vmul.f32 %v2993_v55, %v1405_v60  ;;  %v3826_v1 = vadd.f32 %v2994_v62, %v1412_v61 }
 0xd4c   :  { %v3824_v0 = vadd.f32 %v2994_v62, %v1411_v63 }
 0xd4e   :  { %3294 = vmatprep.mubr.msk.f32.mxu0 %vm156_vm3, %v3824_v0 }
 0xd4f   :  { %3295 = vmatmul.mubr.msk.f32.vlgmr.msra.gmra.mxu0 %vm156_vm3, %v3826_v1 }
 0xd50   :  { %3299 = vmatprep.mubr.msk.f32.mxu0 %vm3486_vm4, %v3485_v11 }
 0xe0f   :  { %v3296_v3 = vpop.f32.mrf.mxu0 }
 0xe10   :  { %v3837_v4 = vadd.f32 %v3296_v3, %v3000_v2 }
 0xe11   :  { %v1501_v5 = vpop.f32.mrf.mxu0 }
 0xe12   :  { %v3839_v6 = vadd.f32 %v3000_v2, %v1501_v5  ;;  %1591 = vrot.lane.b32.xlu1 %v3837_v4, %s3487_s30  ;;  %v1511_v10 = vmul.f32 0.25, %v3837_v4  ;;  %v3010_v5 = vld [vmem:[%s4057_s6 + $0x30] sm:$0xff] }
 0xe14   :  { %1513 = vrot.lane.b32.xlu0 %v3839_v6, %s3487_s30  ;;  %v1510_v59 = vmul.f32 0.25, %v3839_v6 }
 0xe84   :  { %v1592_v8 = vpop.permute.xlu1 %1591 }
 0xe85   :  { %3303 = vmatpush3.xpose.msk.msra.mxu1 %vm309_vm5, %v1592_v8 }
 0xe86   :  { %v1514_v9 = vpop.permute.xlu0 %1513  ;;  %3312 = vmatprep.subr.mxu1 %v3485_v11 }
 0xe87   :  { %3298 = vmatpush3.xpose.msk.msra.mxu0 %vm309_vm5, %v1514_v9 }
 0xe88   :  { %3305 = vmatmul.mubr.msk.f32.vlgmr.msra.gmra.mxu1 %vm309_vm5, %v1511_v10  ;;  %3307 = vmatprep.subr.mxu0 %v3485_v11 }
 0xe89   :  { %3314 = vmatprep.mubr.msk.f32.mxu1 %vm3486_vm4, %v3485_v11 }
 0xe8a   :  { %3300 = vmatmul.mubr.msk.f32.vlgmr.msra.gmra.mxu0 %vm309_vm5, %v1510_v59 }
 0xe8b   :  { %3309 = vmatprep.mubr.msk.f32.mxu0 %vm3486_vm4, %v3485_v11 }
 0xf48   :  { %v1664_v14 = vpop.f32.mrf.mxu1 }
 0xf49   :  { %v1665_v58 = vadd.f32 %v1664_v14, %v3674_v13 }
 0xf4a   :  { %v1586_v12 = vpop.f32.mrf.mxu0  ;;  %v3306_v15 = vpop.f32.mrf.mxu1 }
 0xf4b   :  { %v1587_v16 = vadd.f32 %v1586_v12, %v3671_v7  ;;  %v1671_v17 = vsel %vm463_vm6, %v1665_v58, -inf  ;;  %v3017_v12 = vld [vmem:[%s4057_s6 + $0x38] sm:$0xff] }
 0xf4c   :  { %1672 = vmax.xlane.f32.xlu0 %v1671_v17  ;;  %v3301_v18 = vpop.f32.mrf.mxu0 }
 0xf4d   :  { %v1668_v19 = vsel %vm463_vm6, %v1587_v16, -inf }
 0xf4e   :  { %1669 = vmax.xlane.f32.xlu1 %v1668_v19 }
 0xf5f   :  { %1766 = vrot.lane.b32.xlu1 %v3837_v4, %s3488_s1 }
 0xf62   :  { %1690 = vrot.lane.b32.xlu0 %v3839_v6, %s3488_s1 }
 0xf63   :  { %1847 = vrot.lane.b32.xlu1 %v3839_v6, %s3489_s18 }
 0xfd5   :  { %v1673_v20 = vpop.xlane.xlu0 %1672 }
 0xfd6   :  { %v1675_v21 = vsub.f32 %v1665_v58, %v1673_v20  ;;  %v3018_v58 = vld [vmem:[%s4057_s6 + $0x40] sm:$0xff] }
 0xfd7   :  { %v1670_v22 = vpop.xlane.xlu1 %1669 }
 0xfd8   :  { %v1678_v23 = vmul.f32 1.442695, %v1675_v21  ;;  %v1674_v24 = vsub.f32 %v1587_v16, %v1670_v22  ;;  %v3024_v21 = vld [vmem:[%s4057_s6 + $0x48] ss:$0 sm:$0xff] }
 0xfd9   :  { %v1691_v25 = vpop.permute.xlu0 %1690 }
 0xfda   :  { %3452 = vpow2.f32 %v1678_v23  ;;  %v1676_v26 = vmul.f32 1.442695, %v1674_v24  ;;  %3308 = vmatpush3.msra.mxu0 %v1691_v25 }
 0xfdb   :  { %v1767_v27 = vpop.permute.xlu1 %1766  ;;  %3317 = vmatprep.subr.mxu0 %v3485_v11 }
 0xfdc   :  { %3454 = vpow2.f32 %v1676_v26  ;;  %3313 = vmatpush3.msra.mxu1 %v1767_v27 }
 0xfdd   :  { %3322 = vmatprep.subr.mxu1 %v3485_v11 }
 0xfdf   :  { %v1848_v32 = vpop.permute.xlu1 %1847 }
 0xfe7   :  { %v3453_v28 = vpop.eup %3452 }
 0xfe8   :  { %v1683_v29 = vsel %vm463_vm6, %v3453_v28, 0.0 }
 0xfe9   :  { %v3455_v30 = vpop.eup %3454  ;;  %1684 = vadd.xlane.f32.xlu1 %v1683_v29 }
 0xfea   :  { %v1680_v31 = vsel %vm463_vm6, %v3455_v30, 0.0 }
 0xfeb   :  { %1681 = vadd.xlane.f32.xlu0 %v1680_v31 }
 0xffa   :  { %1845 = vrot.lane.b32.xlu1 %v1510_v59, %s3490_s19 }
0x1001   :  { %1925 = vrot.lane.b32.xlu0 %v3837_v4, %s3489_s18 }
0x1005   :  { %1923 = vrot.lane.b32.xlu0 %v1511_v10, %s3490_s19 }
0x1072   :  { %v1685_v33 = vpop.xlane.xlu1 %1684 }
0x1073   :  { %3456 = vrcp.f32 %v1685_v33 }
0x1074   :  { %v1682_v34 = vpop.xlane.xlu0 %1681 }
0x1075   :  { %3458 = vrcp.f32 %v1682_v34 }
0x1076   :  { %v1846_v41 = vpop.permute.xlu1 %1845 }
0x1078   :  { %v1926_v36 = vpop.permute.xlu0 %1925 }
0x107c   :  { %v1924_v40 = vpop.permute.xlu0 %1923 }
0x1080   :  { %v3457_v35 = vpop.eup %3456 }
0x1081   :  { %v1689_v37 = vmul.f32 %v3457_v35, %v3453_v28 }
0x1082   :  { %v3459_v38 = vpop.eup %3458 }
0x1083   :  { %3315 = vmatmul.mubr.msk.f32.vlgmr.msra.gmra.mxu1 %vm463_vm6, %v1689_v37  ;;  %v1688_v39 = vmul.f32 %v3459_v38, %v3455_v30 }
0x1084   :  { %3323 = vmatpush3.xpose.msk.msra.mxu1 %vm309_vm5, %v1926_v36  ;;  %3324 = vmatprep.mubr.msk.f32.mxu1 %vm3486_vm4, %v3485_v11 }
0x1085   :  { %3310 = vmatmul.mubr.msk.f32.vlgmr.msra.gmra.mxu0 %vm463_vm6, %v1688_v39  ;;  %3332 = vmatprep.subr.mxu1 %v3485_v11 }
0x1086   :  { %3318 = vmatpush3.xpose.msk.msra.mxu0 %vm309_vm5, %v1848_v32  ;;  %3319 = vmatprep.mubr.msk.f32.mxu0 %vm3486_vm4, %v3485_v11 }
0x1087   :  { %3325 = vmatmul.mubr.msk.f32.vlgmr.msra.gmra.mxu1 %vm309_vm5, %v1924_v40  ;;  %3327 = vmatprep.subr.mxu0 %v3485_v11 }
0x1088   :  { %3334 = vmatprep.mubr.msk.f32.mxu1 %vm3486_vm4, %v3485_v11 }
0x1089   :  { %3320 = vmatmul.mubr.msk.f32.vlgmr.msra.gmra.mxu0 %vm309_vm5, %v1846_v41  ;;  %v3029_v41 = vld [vmem:[%s4058_s7 + $0x38] sm:$0xff] }
0x108a   :  { %3329 = vmatprep.mubr.msk.f32.mxu0 %vm3486_vm4, %v3485_v11 }
0x1143   :  { %v1838_v54 = vpop.f32.mrf.mxu1 }
0x1145   :  { %v1762_v52 = vpop.f32.mrf.mxu0  ;;  %v3316_v42 = vpop.f32.mrf.mxu1 }
0x1147   :  { %v3311_v43 = vpop.f32.mrf.mxu0  ;;  %v1997_v44 = vpop.f32.mrf.mxu1 }
0x1148   :  { %v1998_v45 = vadd.f32 %v1997_v44, %v3674_v13 }
0x1149   :  { %v1919_v46 = vpop.f32.mrf.mxu0  ;;  %v3326_v47 = vpop.f32.mrf.mxu1 }
0x114a   :  { %v1920_v48 = vadd.f32 %v1919_v46, %v3671_v7  ;;  %v2004_v49 = vsel %vm463_vm6, %v1998_v45, -inf }
0x114b   :  { %2005 = vmax.xlane.f32.xlu0 %v2004_v49  ;;  %v3321_v50 = vpop.f32.mrf.mxu0  ;;  %v3025_v49 = vld [vmem:[%s4055_s4 + $0x6] ss:$0 sm:$0xff] }
0x114c   :  { %v2001_v51 = vsel %vm463_vm6, %v1920_v48, -inf }
0x114d   :  { %2002 = vmax.xlane.f32.xlu1 %v2001_v51 }
0x11d4   :  { %v2006_v53 = vpop.xlane.xlu0 %2005 }
0x11d5   :  { %v2008_v55 = vsub.f32 %v1998_v45, %v2006_v53 }
0x11d6   :  { %v2003_v56 = vpop.xlane.xlu1 %2002 }
0x11d7   :  { %v2011_v57 = vmul.f32 1.442695, %v2008_v55  ;;  %v2007_v60 = vsub.f32 %v1920_v48, %v2003_v56  ;;  %v3026_v56 = vld [vmem:[%s4055_s4 + $0x7] ss:$0 sm:$0xff] }
0x11d9   :  { %3460 = vpow2.f32 %v2011_v57  ;;  %v2009_v61 = vmul.f32 1.442695, %v2007_v60 }
0x11db   :  { %3462 = vpow2.f32 %v2009_v61 }
0x11e6   :  { %v3461_v13 = vpop.eup %3460 }
0x11e7   :  { %v2016_v62 = vsel %vm463_vm6, %v3461_v13, 0.0 }
0x11e8   :  { %v3463_v63 = vpop.eup %3462  ;;  %2017 = vadd.xlane.f32.xlu1 %v2016_v62  ;;  %v3041_v62 = vld [vmem:[%s4059_s8 + $0x78] sm:$0xff] }
0x11e9   :  { %v2013_v7 = vsel %vm463_vm6, %v3463_v63, 0.0 }
0x11ea   :  { %2014 = vadd.xlane.f32.xlu0 %v2013_v7  ;;  %v3039_v7 = vld [vmem:[%s4059_s8 + $0x68] sm:$0xff] }
0x11f9   :  { %2099 = vrot.lane.b32.xlu1 %v3837_v4, %s3491_s20  ;;  %v3009_v4 = vld [vmem:[%s4057_s6 + $0x28] sm:$0xff] }
0x1200   :  { %2023 = vrot.lane.b32.xlu0 %v3839_v6, %s3491_s20 }
0x1271   :  { %v2018_v2 = vpop.xlane.xlu1 %2017 }
0x1272   :  { %3464 = vrcp.f32 %v2018_v2  ;;  %v3038_v2 = vld [vmem:[%s4059_s8 + $0x60] sm:$0xff] }
0x1273   :  { %v2015_v3 = vpop.xlane.xlu0 %2014 }
0x1274   :  { %3466 = vrcp.f32 %v2015_v3  ;;  %v3037_v3 = vld [vmem:[%s4059_s8 + $0x58] sm:$0xff] }
0x1275   :  { %v2100_v8 = vpop.permute.xlu1 %2099 }
0x1276   :  { %3333 = vmatpush3.msra.mxu1 %v2100_v8  ;;  %v3035_v8 = vld [vmem:[%s4059_s8 + $0x48] sm:$0xff] }
0x1277   :  { %v2024_v9 = vpop.permute.xlu0 %2023  ;;  %3344 = vmatprep.subr.mxu1 %v3010_v5 }
0x1278   :  { %3328 = vmatpush3.msra.mxu0 %v2024_v9  ;;  %v3032_v9 = vld [vmem:[%s4058_s7 + $0x48] ss:$0 sm:$0xff] }
0x1279   :  { %3337 = vmatprep.subr.mxu0 %v3018_v58 }
0x127f   :  { %v3465_v10 = vpop.eup %3464 }
0x1280   :  { %v2022_v59 = vmul.f32 %v3465_v10, %v3461_v13  ;;  %v3042_v13 = vld [vmem:[%s4059_s8 + $0x80] sm:$0xff] }
0x1281   :  { %v3467_v14 = vpop.eup %3466 }
0x1282   :  { %3335 = vmatmul.mubr.msk.f32.vlgmr.msra.gmra.mxu1 %vm463_vm6, %v2022_v59  ;;  %v2021_v6 = vmul.f32 %v3467_v14, %v3463_v63  ;;  %v3040_v63 = vld [vmem:[%s4059_s8 + $0x70] sm:$0xff] }
0x1283   :  { %3345 = vmatpush3.msra.mxu1 %v3010_v5  ;;  %3348 = vmatprep.mubr.msk.f32.mxu1 %vm309_vm5, %v1762_v52  ;;  %v3027_v52 = vld [vmem:[%s4058_s7 + $0x28] sm:$0xff]  ;;  %v3036_v5 = vld [vmem:[%s4059_s8 + $0x50] sm:$0xff] }
0x1284   :  { %3330 = vmatmul.mubr.msk.f32.vlgmr.msra.gmra.mxu0 %vm463_vm6, %v2021_v6  ;;  %3346 = vmatprep.subr.mxu1 %v3009_v4 }
0x1285   :  { %3347 = vmatpush3.msra.mxu1 %v3009_v4  ;;  %3338 = vmatpush3.msra.mxu0 %v3018_v58 }
0x1286   :  { %3349 = vmatmul.mubr.msk.f32.vlgmr.msra.gmra.mxu1 %vm309_vm5, %v1838_v54  ;;  %3339 = vmatprep.subr.mxu0 %v3017_v12  ;;  %v3028_v54 = vld [vmem:[%s4058_s7 + $0x30] sm:$0xff] }
0x1287   :  { %3340 = vmatpush3.msra.mxu0 %v3017_v12  ;;  %3362 = vmatprep.subr.mxu1 %v3042_v13 }
0x1288   :  { %3363 = vmatpush3.msra.mxu1 %v3042_v13 }
0x1289   :  { %3364 = vmatprep.subr.mxu1 %v3041_v62 }
0x128a   :  { %3365 = vmatpush3.msra.mxu1 %v3041_v62  ;;  %v2716_v62 = vld [vmem:[%s4061_s11] sm:$0xf] }
0x128b   :  { %3366 = vmatprep.subr.mxu1 %v3040_v63 }
0x128c   :  { %3367 = vmatpush3.msra.mxu1 %v3040_v63  ;;  %v2714_v63 = vld [vmem:[%s4062_s10 + $0x8] sm:$0xff] }
0x128d   :  { %3368 = vmatprep.subr.mxu1 %v3039_v7 }
0x128e   :  { %3369 = vmatpush3.msra.mxu1 %v3039_v7  ;;  %v2715_v7 = vld [vmem:[%s4063_s2] sm:$0x3] }
0x128f   :  { %3370 = vmatprep.subr.mxu1 %v3038_v2 }
0x1290   :  { %3371 = vmatpush3.msra.mxu1 %v3038_v2  ;;  %v2713_v2 = vld [vmem:[%s4062_s10] sm:$0xff] }
0x1291   :  { %3372 = vmatprep.subr.mxu1 %v3037_v3 }
0x1292   :  { %3373 = vmatpush3.msra.mxu1 %v3037_v3  ;;  %v3049_v3 = vld [vmem:[%s4064_s13] ss:$0 sm:$0xff] }
0x1293   :  { %3374 = vmatprep.subr.mxu1 %v3036_v5 }
0x1294   :  { %3375 = vmatpush3.msra.mxu1 %v3036_v5 }
0x1295   :  { %3376 = vmatprep.subr.mxu1 %v3035_v8 }
0x1296   :  { %3377 = vmatpush3.msra.mxu1 %v3035_v8 }
0x1297   :  { %3397 = vmatprep.subr.mxu1 %v3485_v11 }
0x1342   :  { %v2171_v15 = vpop.f32.mrf.mxu1 }
0x1344   :  { %v2095_v16 = vpop.f32.mrf.mxu0  ;;  %v3336_v17 = vpop.f32.mrf.mxu1 }
0x1345   :  { %3341 = vmatprep.mubr.msk.f32.mxu0 %vm309_vm5, %v2095_v16 }
0x1346   :  { %v3331_v18 = vpop.f32.mrf.mxu0  ;;  %3342 = vmatmul.mubr.msk.f32.vlgmr.msra.gmra.mxu0 %vm309_vm5, %v2171_v15  ;;  %v3350_v19 = vpop.f32.mrf.mxu1 }
0x1348   :  { %v2330_v23 = vpop.f32.mrf.mxu1 }
0x1406   :  { %v3343_v20 = vpop.f32.mrf.mxu0 }
0x1407   :  { %v2336_v22 = vadd.f32 %v3350_v19, %v3343_v20 }
0x1408   :  { %v2249_v24 = vpop.f32.mrf.mxu0 }
0x1409   :  { %v2345_v25 = vadd.f32 %v3024_v21, %v2336_v22  ;;  %v2331_v26 = vadd.f32 %v2330_v23, %v2249_v24  ;;  %v3044_v22 = vld [vmem:[%s4059_s8 + $0x88] ss:$0 sm:$0xff] }
0x140b   :  { %v2344_v27 = vadd.f32 %v3024_v21, %v2331_v26  ;;  %v2347_v28 = vadd.f32 %v2345_v25, %v3826_v1 }
0x140d   :  { %v2353_v29 = vsel %vm156_vm3, %v2347_v28, 0.0  ;;  %v2346_v30 = vadd.f32 %v2344_v27, %v3824_v0  ;;  %v3030_v0 = vld [vmem:[%s4058_s7 + $0x40] sm:$0xff] }
0x140e   :  { %2354 = vadd.xlane.f32.xlu0 %v2353_v29  ;;  %3351 = vmatprep.subr.mxu0 %v3030_v0 }
0x140f   :  { %v2350_v31 = vsel %vm156_vm3, %v2346_v30, 0.0  ;;  %3352 = vmatpush3.msra.mxu0 %v3030_v0  ;;  %v2628_v0 = vld [vmem:[%s4060_s9 + $0x10] sm:$0xff] }
0x1410   :  { %2351 = vadd.xlane.f32.xlu1 %v2350_v31  ;;  %3353 = vmatprep.subr.mxu0 %v3029_v41 }
0x1411   :  { %3354 = vmatpush3.msra.mxu0 %v3029_v41  ;;  %v2627_v41 = vld [vmem:[%s4060_s9 + $0x8] sm:$0xff] }
0x1412   :  { %3355 = vmatprep.subr.mxu0 %v3028_v54 }
0x1413   :  { %3356 = vmatpush3.msra.mxu0 %v3028_v54  ;;  %v2626_v54 = vld [vmem:[%s4060_s9] sm:$0xff] }
0x1414   :  { %3357 = vmatprep.subr.mxu0 %v3027_v52 }
0x1415   :  { %3358 = vmatpush3.msra.mxu0 %v3027_v52 }
0x1416   :  { %3381 = vmatprep.subr.mxu0 %v3485_v11 }
0x1497   :  { %v2355_v32 = vpop.xlane.xlu0 %2354 }
0x1498   :  { %v2357_v33 = vmul.f32 0.03125, %v2355_v32 }
0x1499   :  { %v2352_v34 = vpop.xlane.xlu1 %2351 }
0x149a   :  { %v2359_v35 = vsub.f32 %v2347_v28, %v2357_v33  ;;  %v2356_v36 = vmul.f32 0.03125, %v2352_v34 }
0x149c   :  { %v2358_v37 = vsub.f32 %v2346_v30, %v2356_v36  ;;  %v2361_v38 = vmul.f32 %v2359_v35, %v2359_v35 }
0x149e   :  { %v2365_v39 = vsel %vm156_vm3, %v2361_v38, 0.0  ;;  %v2360_v40 = vmul.f32 %v2358_v37, %v2358_v37 }
0x149f   :  { %2366 = vadd.xlane.f32.xlu1 %v2365_v39 }
0x14a0   :  { %v2362_v1 = vsel %vm156_vm3, %v2360_v40, 0.0 }
0x14a1   :  { %2363 = vadd.xlane.f32.xlu0 %v2362_v1  ;;  %v2629_v1 = vld [vmem:[%s4060_s9 + $0x18] sm:$0xff] }
0x1528   :  { %v2367_v42 = vpop.xlane.xlu1 %2366 }
0x1529   :  { %v2369_v43 = vmul.f32 0.03125, %v2367_v42 }
0x152a   :  { %v2364_v44 = vpop.xlane.xlu0 %2363 }
0x152b   :  { %v2371_v45 = vadd.f32 1e-12, %v2369_v43  ;;  %v2368_v46 = vmul.f32 0.03125, %v2364_v44 }
0x152d   :  { %3468 = vrsqrt.f32 %v2371_v45  ;;  %v2370_v47 = vadd.f32 1e-12, %v2368_v46 }
0x152f   :  { %3470 = vrsqrt.f32 %v2370_v47 }
0x153a   :  { %v3469_v48 = vpop.eup %3468 }
0x153b   :  { %v2375_v50 = vmul.f32 %v3469_v48, %v2359_v35  ;;  %v3047_v48 = vld [vmem:[%s4055_s4 + $0x8] ss:$0 sm:$0xff] }
0x153c   :  { %v3471_v51 = vpop.eup %3470 }
0x153d   :  { %v2374_v53 = vmul.f32 %v3471_v51, %v2358_v37  ;;  %v2381_v55 = vmul.f32 %v3025_v49, %v2375_v50  ;;  %v3048_v51 = vld [vmem:[%s4055_s4 + $0x9] ss:$0 sm:$0xff] }
0x153f   :  { %v2380_v57 = vmul.f32 %v3025_v49, %v2374_v53  ;;  %v2387_v61 = vadd.f32 %v3026_v56, %v2381_v55 }
0x1541   :  { %v2386_v60 = vadd.f32 %v3026_v56, %v2380_v57 }
0x1543   :  { %3359 = vmatprep.mubr.msk.f32.mxu0 %vm156_vm3, %v2386_v60 }
0x1544   :  { %3360 = vmatmul.mubr.msk.f32.vlgmr.msra.gmra.mxu0 %vm156_vm3, %v2387_v61 }
0x1545   :  { %3389 = vmatprep.mubr.msk.f32.mxu0 %vm3486_vm4, %v3485_v11  ;;  %3382 = vmatpush3.msra.mxu0 %v2629_v1 }
0x1546   :  { %3383 = vmatprep.subr.mxu0 %v3485_v11 }
0x1547   :  { %3384 = vmatpush3.msra.mxu0 %v2628_v0 }
0x1548   :  { %3385 = vmatprep.subr.mxu0 %v3485_v11 }
0x1549   :  { %3386 = vmatpush3.msra.mxu0 %v2627_v41 }
0x154a   :  { %3387 = vmatprep.subr.mxu0 %v3485_v11 }
0x154b   :  { %3388 = vmatpush3.msra.mxu0 %v2626_v54 }
0x154c   :  { %3392 = vmatprep.subr.mxu0 %v3485_v11 }
0x1604   :  { %v3361_v10 = vpop.f32.mrf.mxu0 }
0x1605   :  { %v2476_v59 = vadd.f32 %v3361_v10, %v3032_v9 }
0x1606   :  { %v2470_v14 = vpop.f32.mrf.mxu0 }
0x1607   :  { %v2482_v4 = vmul.f32 0.70710677, %v2476_v59  ;;  %v2471_v6 = vadd.f32 %v3032_v9, %v2470_v14  ;;  %v2480_v19 = vmul.f32 0.5, %v2476_v59 }
0x1609   :  { %3472 = verf.f32 %v2482_v4  ;;  %v2481_v58 = vmul.f32 0.70710677, %v2471_v6  ;;  %v2479_v17 = vmul.f32 0.5, %v2471_v6  ;;  %v2876_v4 = vld [vmem:[%s4065_s12 + $0x8] sm:$0xff]  ;;  %v2875_v6 = vld [vmem:[%s4065_s12] sm:$0xff] }
0x160b   :  { %3474 = verf.f32 %v2481_v58 }
0x1616   :  { %v3473_v12 = vpop.eup %3472 }
0x1617   :  { %v2486_v16 = vadd.f32 1.0, %v3473_v12  ;;  %v3054_v12 = vld [vmem:[%s4064_s13 + $0x1] ss:$0 sm:$0xff] }
0x1618   :  { %v3475_v15 = vpop.eup %3474 }
0x1619   :  { %v2485_v18 = vadd.f32 1.0, %v3475_v15  ;;  %v2488_v21 = vmul.f32 %v2486_v16, %v2480_v19  ;;  %v3055_v19 = vld [vmem:[%s4064_s13 + $0x2] ss:$0 sm:$0xff] }
0x161b   :  { %v2487_v20 = vmul.f32 %v2485_v18, %v2479_v17 }
0x161d   :  { %3378 = vmatprep.mubr.msk.f32.mxu1 %vm69_vm0, %v2487_v20 }
0x161e   :  { %3379 = vmatmul.mubr.msk.f32.vlgmr.msra.gmra.mxu1 %vm69_vm0, %v2488_v21 }
0x161f   :  { %3401 = vmatprep.mubr.msk.f32.mxu1 %vm3486_vm4, %v3485_v11  ;;  %3398 = vmatpush3.msra.mxu1 %v2714_v63 }
0x1620   :  { %3399 = vmatprep.subr.mxu1 %v3485_v11 }
0x1621   :  { %3400 = vmatpush3.msra.mxu1 %v2713_v2 }
0x16de   :  { %v3380_v23 = vpop.f32.mrf.mxu1 }
0x16df   :  { %v2581_v24 = vadd.f32 %v3380_v23, %v3044_v22 }
0x16e0   :  { %v2575_v25 = vpop.f32.mrf.mxu1 }
0x16e1   :  { %v2576_v26 = vadd.f32 %v3044_v22, %v2575_v25  ;;  %v2585_v27 = vadd.f32 %v2581_v24, %v2387_v61 }
0x16e3   :  { %v2591_v28 = vsel %vm156_vm3, %v2585_v27, 0.0  ;;  %v2584_v29 = vadd.f32 %v2576_v26, %v2386_v60 }
0x16e4   :  { %2592 = vadd.xlane.f32.xlu0 %v2591_v28 }
0x16e5   :  { %v2588_v30 = vsel %vm156_vm3, %v2584_v29, 0.0 }
0x16e6   :  { %2589 = vadd.xlane.f32.xlu1 %v2588_v30 }
0x176d   :  { %v2593_v31 = vpop.xlane.xlu0 %2592 }
0x176e   :  { %v2595_v32 = vmul.f32 0.03125, %v2593_v31 }
0x176f   :  { %v2590_v33 = vpop.xlane.xlu1 %2589 }
0x1770   :  { %v2597_v34 = vsub.f32 %v2585_v27, %v2595_v32  ;;  %v2594_v35 = vmul.f32 0.03125, %v2590_v33 }
0x1772   :  { %v2596_v36 = vsub.f32 %v2584_v29, %v2594_v35  ;;  %v2599_v37 = vmul.f32 %v2597_v34, %v2597_v34 }
0x1774   :  { %v2603_v38 = vsel %vm156_vm3, %v2599_v37, 0.0  ;;  %v2598_v39 = vmul.f32 %v2596_v36, %v2596_v36 }
0x1775   :  { %2604 = vadd.xlane.f32.xlu0 %v2603_v38 }
0x1776   :  { %v2600_v40 = vsel %vm156_vm3, %v2598_v39, 0.0 }
0x1777   :  { %2601 = vadd.xlane.f32.xlu1 %v2600_v40 }
0x17fe   :  { %v2605_v52 = vpop.xlane.xlu0 %2604 }
0x17ff   :  { %v2607_v42 = vmul.f32 0.03125, %v2605_v52 }
0x1800   :  { %v2602_v43 = vpop.xlane.xlu1 %2601 }
0x1801   :  { %v2609_v44 = vadd.f32 1e-12, %v2607_v42  ;;  %v2606_v45 = vmul.f32 0.03125, %v2602_v43 }
0x1803   :  { %3476 = vrsqrt.f32 %v2609_v44  ;;  %v2608_v46 = vadd.f32 1e-12, %v2606_v45 }
0x1805   :  { %3478 = vrsqrt.f32 %v2608_v46 }
0x1810   :  { %v3477_v47 = vpop.eup %3476 }
0x1811   :  { %v2613_v49 = vmul.f32 %v3477_v47, %v2597_v34 }
0x1812   :  { %v3479_v50 = vpop.eup %3478 }
0x1813   :  { %v2612_v53 = vmul.f32 %v3479_v50, %v2596_v36  ;;  %v2619_v55 = vmul.f32 %v3047_v48, %v2613_v49 }
0x1815   :  { %v2618_v56 = vmul.f32 %v3047_v48, %v2612_v53  ;;  %v2625_v57 = vadd.f32 %v3048_v51, %v2619_v55 }
0x1817   :  { %v2624_v60 = vadd.f32 %v3048_v51, %v2618_v56  ;;  %v2637_v61 = vrot.slane %v2625_v57, 7 }
0x1819   :  { %v2639_v13 = vsel %vm2638_vm7, %v2637_v61, %v2624_v60 }
0x181a   :  { %3390 = vmatmul.mubr.msk.f32.vlgmr.msra.gmra.mxu0 %vm156_vm3, %v2639_v13 }
0x181b   :  { %3394 = vmatprep.mubr.msk.f32.mxu0 %vm3486_vm4, %v3485_v11  ;;  %3393 = vmatpush3.msk.msra.mxu0 %vm2721_vm8, %v2716_v62 }
0x181c   :  { %3404 = vmatprep.subr.mxu0 %v3485_v11 }
0x181e   :  { %3395 = vmatmul.mubr.msk.f32.vlgmr.msra.gmra.mxu0 %vm2717_vm9, %v2715_v7 }
0x181f   :  { %3408 = vmatprep.mubr.msk.f32.mxu0 %vm3486_vm4, %v3485_v11  ;;  %3405 = vmatpush3.msra.mxu0 %v2876_v4 }
0x1820   :  { %3406 = vmatprep.subr.mxu0 %v3485_v11 }
0x1821   :  { %3407 = vmatpush3.msra.mxu0 %v2875_v6 }
0x18da   :  { %v2708_v5 = vpop.f32.mrf.mxu0 }
0x18db   :  { %v2709_v8 = vadd.f32 %v3049_v3, %v2708_v5 }
0x18dc   :  { %v3391_v9 = vpop.f32.mrf.mxu0 }
0x18dd   :  { %3480 = vtanh.f32 %v2709_v8 }
0x18de   :  { %v2791_v59 = vpop.f32.mrf.mxu0 }
0x18e0   :  { %v3396_v14 = vpop.f32.mrf.mxu0 }
0x18ea   :  { %v3481_v10 = vpop.eup %3480 }
0x18eb   :  { %3402 = vmatmul.mubr.msk.f32.vlgmr.msra.gmra.mxu1 %vm309_vm5, %v3481_v10 }
0x19ab   :  { %v2864_v58 = vpop.f32.mrf.mxu1 }
0x19ac   :  { %v2865_v15 = vadd.f32 %v2864_v58, %v2791_v59 }
0x19ad   :  { %v3403_v16 = vpop.f32.mrf.mxu1 }
0x19ae   :  { %v2873_v17 = vadd.f32 %v3054_v12, %v2865_v15 }
0x19b0   :  { %3482 = vtanh.f32 %v2873_v17 }
0x19bd   :  { %v3483_v18 = vpop.eup %3482 }
0x19be   :  { %3409 = vmatmul.mubr.msk.f32.vlgmr.msra.gmra.mxu0 %vm309_vm5, %v3483_v18 }
0x1a7e   :  { %v2951_v20 = vpop.f32.mrf.mxu0 }
0x1a7f   :  { %v2952_v11 = vadd.f32 %v3055_v19, %v2951_v20 }
0x1a80   :  { %v3410_v21 = vpop.f32.mrf.mxu0 }
0x1a81   :  { %2956 = vst.msk [vmem:[%s4066_s14] sm:$0x3] %vm2955_vm10, %v2952_v11 }

</bundles_post_ra>
